<compile_context>
chip_gen: v6e
topology: v6e:2x2x1
jax: 0.10.0
libtpu: 0.0.40
codegen_flags: <defaults>
</compile_context>

<pallas_src>
import functools

import jax
import jax.numpy as jnp
from jax.experimental import pallas as pl
from jax.experimental.pallas import tpu as pltpu

_INV_SQRT2 = 0.7071067811865476
_LN_EPS = 1e-5
_LANE = 128
_MM_DTYPE = jnp.bfloat16        # MXU operand dtype (accumulation stays f32)


def _gelu(x):
    # exact (erf-based) GELU, matching torch.nn.GELU() default
    return 0.5 * x * (1.0 + jax.lax.erf(x * _INV_SQRT2))


def _layernorm(x, gamma, beta):
    mu = jnp.mean(x, axis=-1, keepdims=True)
    var = jnp.mean(jnp.square(x - mu), axis=-1, keepdims=True)
    return (x - mu) * jax.lax.rsqrt(var + _LN_EPS) * gamma + beta


def _mm(a, b):
    """MXU matmul: bf16 operands, float32 accumulation."""
    return jnp.dot(a.astype(_MM_DTYPE), b.astype(_MM_DTYPE),
                   preferred_element_type=jnp.float32)


# ---------------------------------------------------------------------------
# Fused forward kernel (one batch group per grid step, resident in VMEM)
# ---------------------------------------------------------------------------
def _make_fused_kernel(depth):
    def kernel(*refs):
        out_ref = refs[-1]
        it = iter(refs[:-1])
        xp_ref, ew_ref, eb_ref = next(it), next(it), next(it)
        blocks = [tuple(next(it) for _ in range(12)) for _ in range(depth)]
        cg_ref, cb_ref, cw_ref, cc_ref, pool_ref = (next(it) for _ in range(5))

        # ---- patch embedding: (N*Bg, K) @ (K, D) + b  -> residual stream ----
        x = _mm(xp_ref[...], ew_ref[...]) + eb_ref[...]          # (M, D) f32

        # ---- mixer blocks (all activations stay (M, D)/(M, Cd) in VMEM) -----
        for (g1, b1, w1, c1, w2, c2, g2, b2, w3, c3, w4, c4) in blocks:
            # token mixing: Conv1d(k=1) over the patch axis, batched via the
            # block-diagonal (S*Bg, N*Bg) weight.  DropPath(0) == identity.
            h = _layernorm(x, g1[...], b1[...])                  # (M, D)
            t = _gelu(_mm(w1[...], h) + c1[...])                 # (S*Bg, D)
            x = x + _mm(w2[...], t) + c2[...]                    # (M, D)

            # channel mixing: Linear over hidden dim, batch folded into rows.
            h = _layernorm(x, g2[...], b2[...])                  # (M, D)
            u = _gelu(_mm(h, w3[...]) + c3[...])                 # (M, Cd)
            x = x + _mm(u, w4[...]) + c4[...]                    # (M, D)

        # ---- classifier: LN -> mean over patches (as a matmul) -> Linear ----
        h = _layernorm(x, cg_ref[...], cb_ref[...])              # (M, D)
        pooled = jnp.dot(pool_ref[...], h,
                         preferred_element_type=jnp.float32)     # (Bg, D)
        logits = _mm(pooled, cw_ref[...]) + cc_ref[...]          # (Bg, NC_pad)
        out_ref[...] = logits.astype(out_ref.dtype)

    return kernel


# ---------------------------------------------------------------------------
# Wrapper: layout glue + single pallas_call
# ---------------------------------------------------------------------------
def mixer_forward(x_nchw, params, *, patch_size, num_groups=None):
    B, C, H, W = x_nchw.shape
    ps = patch_size
    gh, gw = H // ps, W // ps
    N, K = gh * gw, C * ps * ps
    D = params["emb_w"].shape[1]
    NC = params["cls_w"].shape[1]
    NCp = pl.cdiv(NC, _LANE) * _LANE          # lane-dense classifier output
    depth = len(params["blocks"])

    if num_groups is None:                    # >=2 grid steps feed v7x's 2 TCs
        num_groups = 2 if (B % 2 == 0 and B >= 2) else 1
    G = num_groups
    assert B % G == 0, "batch must divide evenly into groups"
    Bg = B // G
    M = N * Bg

    # --- glue: NCHW -> (G, N*Bg, K) patches; rows ordered (patch n, batch b),
    # patch features ordered (c, p1, p2) == Conv2d(stride=patch) embedding.
    xp = x_nchw.reshape(B, C, gh, ps, gw, ps).transpose(0, 2, 4, 1, 3, 5)
    xp = xp.reshape(G, Bg, N, K).transpose(0, 2, 1, 3).reshape(G, M, K)
    xp = xp.astype(_MM_DTYPE)

    f32 = lambda a: jnp.asarray(a, jnp.float32)
    bf16 = lambda a: jnp.asarray(a, _MM_DTYPE)
    eye = jnp.eye(Bg, dtype=jnp.float32)
    kron = lambda w: jnp.kron(f32(w), eye)            # fold batch into rows
    rep = lambda c: jnp.repeat(f32(c), Bg, axis=0)    # matching bias layout

    inputs = [xp, bf16(params["emb_w"]), f32(params["emb_b"])]
    for blk in params["blocks"]:
        inputs += [
            f32(blk["g1"]), f32(blk["b1"]),
            bf16(kron(blk["w1"])), rep(blk["c1"]),     # (S*Bg, N*Bg), (S*Bg, 1)
            bf16(kron(blk["w2"])), rep(blk["c2"]),     # (N*Bg, S*Bg), (N*Bg, 1)
            f32(blk["g2"]), f32(blk["b2"]),
            bf16(blk["w3"]), f32(blk["c3"]),           # (D, Cd), (1, Cd)
            bf16(blk["w4"]), f32(blk["c4"]),           # (Cd, D), (1, D)
        ]
    # zero-pad classifier to a multiple of 128 lanes; slice after the call
    cls_w = jnp.zeros((D, NCp), jnp.float32).at[:, :NC].set(f32(params["cls_w"]))
    cls_c = jnp.zeros((1, NCp), jnp.float32).at[:, :NC].set(f32(params["cls_c"]))
    # mean-over-patches pooling expressed as a (Bg, N*Bg) matmul operand
    pool = jnp.kron(jnp.full((1, N), 1.0 / N, jnp.float32), eye)
    inputs += [f32(params["cls_g"]), f32(params["cls_b"]),
               bf16(cls_w), cls_c, pool]

    def resident(arr):
        # Full-array block + constant index_map: loaded once, stays in VMEM
        # for every grid step (the pipeline never re-fetches unchanged blocks).
        return pl.BlockSpec(arr.shape, lambda g, nd=arr.ndim: (0,) * nd)

    in_specs = [pl.BlockSpec((None, M, K), lambda g: (g, 0, 0))]
    in_specs += [resident(a) for a in inputs[1:]]

    out = pl.pallas_call(
        _make_fused_kernel(depth),
        out_shape=jax.ShapeDtypeStruct((G, Bg, NCp), jnp.float32),
        grid=(G,),
        in_specs=in_specs,
        out_specs=pl.BlockSpec((None, Bg, NCp), lambda g: (g, 0, 0)),
        compiler_params=pltpu.CompilerParams(
            dimension_semantics=("parallel",),
        ),
    )(*inputs)
    return out.reshape(B, NCp)[:, :NC]


# ---------------------------------------------------------------------------
# Plain-JAX reference with the same numerics policy (for validation)
# ---------------------------------------------------------------------------
def mixer_reference(x_nchw, params, *, patch_size):
    B, C, H, W = x_nchw.shape
    ps = patch_size
    gh, gw = H // ps, W // ps
    N, K = gh * gw, C * ps * ps

    def mm(a, b, eq):
        return jnp.einsum(eq, a.astype(_MM_DTYPE), b.astype(_MM_DTYPE),
                          preferred_element_type=jnp.float32)

    xp = x_nchw.reshape(B, C, gh, ps, gw, ps).transpose(0, 2, 4, 1, 3, 5)
    xp = xp.reshape(B, N, K)
    x = mm(xp, params["emb_w"], "bnk,kd->bnd") + params["emb_b"]
    for blk in params["blocks"]:
        h = _layernorm(x, blk["g1"], blk["b1"])
        t = _gelu(mm(blk["w1"], h, "sn,bnd->bsd") + blk["c1"][None, :, :])
        x = x + mm(blk["w2"], t, "ns,bsd->bnd") + blk["c2"][None, :, :]
        h = _layernorm(x, blk["g2"], blk["b2"])
        u = _gelu(mm(h, blk["w3"], "bnd,dc->bnc") + blk["c3"])
        x = x + mm(u, blk["w4"], "bnc,cd->bnd") + blk["c4"]
    h = _layernorm(x, params["cls_g"], params["cls_b"])
    pooled = jnp.mean(h, axis=1)
    return mm(pooled, params["cls_w"], "bd,dc->bc") + params["cls_c"]


if __name__ == "__main__":
    # Small config consistent with the module's constructor.
    B = 4
    image_size, patch_size, channel = 16, 4, 3
    hidden_dim, spatial_dim, channel_dim = 32, 16, 64
    depth, num_classes = 2, 10
    num_patches = (image_size // patch_size) ** 2            # 16
    K = channel * patch_size * patch_size                    # 48

    keys = iter(jax.random.split(jax.random.PRNGKey(0), 64))

    def nrm(shape, scale=0.02):
        return scale * jax.random.normal(next(keys), shape, dtype=jnp.float32)

    params = dict(
        emb_w=nrm((K, hidden_dim)),
        emb_b=nrm((1, hidden_dim), 0.01),
        blocks=[dict(
            g1=1.0 + nrm((1, hidden_dim), 0.01), b1=nrm((1, hidden_dim), 0.01),
            w1=nrm((spatial_dim, num_patches)),  c1=nrm((spatial_dim, 1), 0.01),
            w2=nrm((num_patches, spatial_dim)),  c2=nrm((num_patches, 1), 0.01),
            g2=1.0 + nrm((1, hidden_dim), 0.01), b2=nrm((1, hidden_dim), 0.01),
            w3=nrm((hidden_dim, channel_dim)),   c3=nrm((1, channel_dim), 0.01),
            w4=nrm((channel_dim, hidden_dim)),   c4=nrm((1, hidden_dim), 0.01),
        ) for _ in range(depth)],
        cls_g=1.0 + nrm((1, hidden_dim), 0.01),
        cls_b=nrm((1, hidden_dim), 0.01),
        cls_w=nrm((hidden_dim, num_classes)),
        cls_c=nrm((1, num_classes), 0.01),
    )

    # input image, NCHW like PyTorch
    x = jax.random.normal(next(keys), (B, channel, image_size, image_size),
                          dtype=jnp.float32)

    fwd = jax.jit(functools.partial(mixer_forward, patch_size=patch_size))
    logits = fwd(x, params)
    jax.block_until_ready(logits)

    assert logits.shape == (B, num_classes) and logits.dtype == jnp.float32
    assert bool(jnp.all(jnp.isfinite(logits)))

    # cross-check against a plain-JAX reference using the same numerics policy
    ref = mixer_reference(x, params, patch_size=patch_size)
    assert bool(jnp.allclose(logits, ref, rtol=5e-2, atol=1e-3)), (
        float(jnp.max(jnp.abs(logits - ref))))

    print("KERNEL_OK")
</pallas_src>

<mosaic_0001>
module attributes {stable_mosaic.version = 11 : i64} {
  func.func @kernel(%arg0: i32, %arg1: memref<1x32x48xbf16, #tpu.memory_space<vmem>>, %arg2: memref<48x32xbf16, #tpu.memory_space<vmem>>, %arg3: memref<1x32xf32, #tpu.memory_space<vmem>>, %arg4: memref<1x32xf32, #tpu.memory_space<vmem>>, %arg5: memref<1x32xf32, #tpu.memory_space<vmem>>, %arg6: memref<32x32xbf16, #tpu.memory_space<vmem>>, %arg7: memref<32x1xf32, #tpu.memory_space<vmem>>, %arg8: memref<32x32xbf16, #tpu.memory_space<vmem>>, %arg9: memref<32x1xf32, #tpu.memory_space<vmem>>, %arg10: memref<1x32xf32, #tpu.memory_space<vmem>>, %arg11: memref<1x32xf32, #tpu.memory_space<vmem>>, %arg12: memref<32x64xbf16, #tpu.memory_space<vmem>>, %arg13: memref<1x64xf32, #tpu.memory_space<vmem>>, %arg14: memref<64x32xbf16, #tpu.memory_space<vmem>>, %arg15: memref<1x32xf32, #tpu.memory_space<vmem>>, %arg16: memref<1x32xf32, #tpu.memory_space<vmem>>, %arg17: memref<1x32xf32, #tpu.memory_space<vmem>>, %arg18: memref<32x32xbf16, #tpu.memory_space<vmem>>, %arg19: memref<32x1xf32, #tpu.memory_space<vmem>>, %arg20: memref<32x32xbf16, #tpu.memory_space<vmem>>, %arg21: memref<32x1xf32, #tpu.memory_space<vmem>>, %arg22: memref<1x32xf32, #tpu.memory_space<vmem>>, %arg23: memref<1x32xf32, #tpu.memory_space<vmem>>, %arg24: memref<32x64xbf16, #tpu.memory_space<vmem>>, %arg25: memref<1x64xf32, #tpu.memory_space<vmem>>, %arg26: memref<64x32xbf16, #tpu.memory_space<vmem>>, %arg27: memref<1x32xf32, #tpu.memory_space<vmem>>, %arg28: memref<1x32xf32, #tpu.memory_space<vmem>>, %arg29: memref<1x32xf32, #tpu.memory_space<vmem>>, %arg30: memref<32x128xbf16, #tpu.memory_space<vmem>>, %arg31: memref<1x128xf32, #tpu.memory_space<vmem>>, %arg32: memref<2x32xf32, #tpu.memory_space<vmem>>, %arg33: memref<1x2x128xf32, #tpu.memory_space<vmem>>) attributes {dimension_semantics = [#tpu.dimension_semantics<parallel>], iteration_bounds = array<i64: 2>, scalar_prefetch = 0 : i64, scratch_operands = 0 : i64, tpu.core_type = #tpu.core_type<tc>, window_params = [{transform_indices = @transform_0, window_bounds = array<i64: 1, 32, 48>}, {pipeline_mode = #tpu.pipeline_mode<synchronous>, transform_indices = @transform_1, window_bounds = array<i64: 48, 32>}, {pipeline_mode = #tpu.pipeline_mode<synchronous>, transform_indices = @transform_2, window_bounds = array<i64: 1, 32>}, {pipeline_mode = #tpu.pipeline_mode<synchronous>, transform_indices = @transform_3, window_bounds = array<i64: 1, 32>}, {pipeline_mode = #tpu.pipeline_mode<synchronous>, transform_indices = @transform_4, window_bounds = array<i64: 1, 32>}, {pipeline_mode = #tpu.pipeline_mode<synchronous>, transform_indices = @transform_5, window_bounds = array<i64: 32, 32>}, {pipeline_mode = #tpu.pipeline_mode<synchronous>, transform_indices = @transform_6, window_bounds = array<i64: 32, 1>}, {pipeline_mode = #tpu.pipeline_mode<synchronous>, transform_indices = @transform_7, window_bounds = array<i64: 32, 32>}, {pipeline_mode = #tpu.pipeline_mode<synchronous>, transform_indices = @transform_8, window_bounds = array<i64: 32, 1>}, {pipeline_mode = #tpu.pipeline_mode<synchronous>, transform_indices = @transform_9, window_bounds = array<i64: 1, 32>}, {pipeline_mode = #tpu.pipeline_mode<synchronous>, transform_indices = @transform_10, window_bounds = array<i64: 1, 32>}, {pipeline_mode = #tpu.pipeline_mode<synchronous>, transform_indices = @transform_11, window_bounds = array<i64: 32, 64>}, {pipeline_mode = #tpu.pipeline_mode<synchronous>, transform_indices = @transform_12, window_bounds = array<i64: 1, 64>}, {pipeline_mode = #tpu.pipeline_mode<synchronous>, transform_indices = @transform_13, window_bounds = array<i64: 64, 32>}, {pipeline_mode = #tpu.pipeline_mode<synchronous>, transform_indices = @transform_14, window_bounds = array<i64: 1, 32>}, {pipeline_mode = #tpu.pipeline_mode<synchronous>, transform_indices = @transform_15, window_bounds = array<i64: 1, 32>}, {pipeline_mode = #tpu.pipeline_mode<synchronous>, transform_indices = @transform_16, window_bounds = array<i64: 1, 32>}, {pipeline_mode = #tpu.pipeline_mode<synchronous>, transform_indices = @transform_17, window_bounds = array<i64: 32, 32>}, {pipeline_mode = #tpu.pipeline_mode<synchronous>, transform_indices = @transform_18, window_bounds = array<i64: 32, 1>}, {pipeline_mode = #tpu.pipeline_mode<synchronous>, transform_indices = @transform_19, window_bounds = array<i64: 32, 32>}, {pipeline_mode = #tpu.pipeline_mode<synchronous>, transform_indices = @transform_20, window_bounds = array<i64: 32, 1>}, {pipeline_mode = #tpu.pipeline_mode<synchronous>, transform_indices = @transform_21, window_bounds = array<i64: 1, 32>}, {pipeline_mode = #tpu.pipeline_mode<synchronous>, transform_indices = @transform_22, window_bounds = array<i64: 1, 32>}, {pipeline_mode = #tpu.pipeline_mode<synchronous>, transform_indices = @transform_23, window_bounds = array<i64: 32, 64>}, {pipeline_mode = #tpu.pipeline_mode<synchronous>, transform_indices = @transform_24, window_bounds = array<i64: 1, 64>}, {pipeline_mode = #tpu.pipeline_mode<synchronous>, transform_indices = @transform_25, window_bounds = array<i64: 64, 32>}, {pipeline_mode = #tpu.pipeline_mode<synchronous>, transform_indices = @transform_26, window_bounds = array<i64: 1, 32>}, {pipeline_mode = #tpu.pipeline_mode<synchronous>, transform_indices = @transform_27, window_bounds = array<i64: 1, 32>}, {pipeline_mode = #tpu.pipeline_mode<synchronous>, transform_indices = @transform_28, window_bounds = array<i64: 1, 32>}, {pipeline_mode = #tpu.pipeline_mode<synchronous>, transform_indices = @transform_29, window_bounds = array<i64: 32, 128>}, {pipeline_mode = #tpu.pipeline_mode<synchronous>, transform_indices = @transform_30, window_bounds = array<i64: 1, 128>}, {pipeline_mode = #tpu.pipeline_mode<synchronous>, transform_indices = @transform_31, window_bounds = array<i64: 2, 32>}, {transform_indices = @transform_32, window_bounds = array<i64: 1, 2, 128>}]} {
    %c0 = arith.constant 0 : index
    %c0_0 = arith.constant 0 : index
    %c0_1 = arith.constant 0 : index
    %0 = vector.load %arg1[%c0, %c0_0, %c0_1] : memref<1x32x48xbf16, #tpu.memory_space<vmem>>, vector<1x32x48xbf16>
    %1 = vector.shape_cast %0 : vector<1x32x48xbf16> to vector<32x48xbf16>
    %c0_2 = arith.constant 0 : index
    %c0_3 = arith.constant 0 : index
    %2 = vector.load %arg2[%c0_2, %c0_3] : memref<48x32xbf16, #tpu.memory_space<vmem>>, vector<48x32xbf16>
    %cst = arith.constant dense<0.000000e+00> : vector<32x32xf32>
    %3 = tpu.matmul %1, %2, %cst {dimension_numbers = #tpu.dot_dimension_numbers<[1], [0], [0], [1], [0, 0, 1, 1], [], []>} : vector<32x48xbf16>, vector<48x32xbf16>, vector<32x32xf32> -> vector<32x32xf32>
    %c0_4 = arith.constant 0 : index
    %c0_5 = arith.constant 0 : index
    %4 = vector.load %arg3[%c0_4, %c0_5] : memref<1x32xf32, #tpu.memory_space<vmem>>, vector<1x32xf32>
    %5 = vector.broadcast %4 : vector<1x32xf32> to vector<32x32xf32>
    %6 = arith.addf %3, %5 : vector<32x32xf32>
    %c0_6 = arith.constant 0 : index
    %c0_7 = arith.constant 0 : index
    %7 = vector.load %arg4[%c0_6, %c0_7] : memref<1x32xf32, #tpu.memory_space<vmem>>, vector<1x32xf32>
    %c0_8 = arith.constant 0 : index
    %c0_9 = arith.constant 0 : index
    %8 = vector.load %arg5[%c0_8, %c0_9] : memref<1x32xf32, #tpu.memory_space<vmem>>, vector<1x32xf32>
    %cst_10 = arith.constant dense<0.000000e+00> : vector<32xf32>
    %9 = vector.multi_reduction <add>, %6, %cst_10 [1] : vector<32x32xf32> to vector<32xf32>
    %10 = vector.shape_cast %9 : vector<32xf32> to vector<32x1xf32>
    %cst_11 = arith.constant 3.200000e+01 : f32
    %11 = vector.broadcast %cst_11 : f32 to vector<32x1xf32>
    %12 = arith.divf %10, %11 : vector<32x1xf32>
    %13 = vector.broadcast %12 : vector<32x1xf32> to vector<32x32xf32>
    %14 = arith.subf %6, %13 : vector<32x32xf32>
    %15 = arith.mulf %14, %14 : vector<32x32xf32>
    %cst_12 = arith.constant dense<0.000000e+00> : vector<32xf32>
    %16 = vector.multi_reduction <add>, %15, %cst_12 [1] : vector<32x32xf32> to vector<32xf32>
    %17 = vector.shape_cast %16 : vector<32xf32> to vector<32x1xf32>
    %cst_13 = arith.constant 3.200000e+01 : f32
    %18 = vector.broadcast %cst_13 : f32 to vector<32x1xf32>
    %19 = arith.divf %17, %18 : vector<32x1xf32>
    %20 = vector.broadcast %12 : vector<32x1xf32> to vector<32x32xf32>
    %21 = arith.subf %6, %20 : vector<32x32xf32>
    %cst_14 = arith.constant 9.99999974E-6 : f32
    %22 = vector.broadcast %cst_14 : f32 to vector<32x1xf32>
    %23 = arith.addf %19, %22 : vector<32x1xf32>
    %24 = math.rsqrt %23 : vector<32x1xf32>
    %25 = vector.broadcast %24 : vector<32x1xf32> to vector<32x32xf32>
    %26 = arith.mulf %21, %25 : vector<32x32xf32>
    %27 = vector.broadcast %7 : vector<1x32xf32> to vector<32x32xf32>
    %28 = arith.mulf %26, %27 : vector<32x32xf32>
    %29 = vector.broadcast %8 : vector<1x32xf32> to vector<32x32xf32>
    %30 = arith.addf %28, %29 : vector<32x32xf32>
    %c0_15 = arith.constant 0 : index
    %c0_16 = arith.constant 0 : index
    %31 = vector.load %arg6[%c0_15, %c0_16] : memref<32x32xbf16, #tpu.memory_space<vmem>>, vector<32x32xbf16>
    %32 = arith.truncf %30 : vector<32x32xf32> to vector<32x32xbf16>
    %cst_17 = arith.constant dense<0.000000e+00> : vector<32x32xf32>
    %33 = tpu.matmul %31, %32, %cst_17 {dimension_numbers = #tpu.dot_dimension_numbers<[1], [0], [0], [1], [0, 0, 1, 1], [], []>} : vector<32x32xbf16>, vector<32x32xbf16>, vector<32x32xf32> -> vector<32x32xf32>
    %c0_18 = arith.constant 0 : index
    %c0_19 = arith.constant 0 : index
    %34 = vector.load %arg7[%c0_18, %c0_19] : memref<32x1xf32, #tpu.memory_space<vmem>>, vector<32x1xf32>
    %35 = vector.broadcast %34 : vector<32x1xf32> to vector<32x32xf32>
    %36 = arith.addf %33, %35 : vector<32x32xf32>
    %cst_20 = arith.constant 5.000000e-01 : f32
    %37 = vector.broadcast %cst_20 : f32 to vector<32x32xf32>
    %38 = arith.mulf %37, %36 : vector<32x32xf32>
    %cst_21 = arith.constant 0.707106769 : f32
    %39 = vector.broadcast %cst_21 : f32 to vector<32x32xf32>
    %40 = arith.mulf %36, %39 : vector<32x32xf32>
    %41 = math.erf %40 : vector<32x32xf32>
    %cst_22 = arith.constant 1.000000e+00 : f32
    %42 = vector.broadcast %cst_22 : f32 to vector<32x32xf32>
    %43 = arith.addf %42, %41 : vector<32x32xf32>
    %44 = arith.mulf %38, %43 : vector<32x32xf32>
    %c0_23 = arith.constant 0 : index
    %c0_24 = arith.constant 0 : index
    %45 = vector.load %arg8[%c0_23, %c0_24] : memref<32x32xbf16, #tpu.memory_space<vmem>>, vector<32x32xbf16>
    %46 = arith.truncf %44 : vector<32x32xf32> to vector<32x32xbf16>
    %cst_25 = arith.constant dense<0.000000e+00> : vector<32x32xf32>
    %47 = tpu.matmul %45, %46, %cst_25 {dimension_numbers = #tpu.dot_dimension_numbers<[1], [0], [0], [1], [0, 0, 1, 1], [], []>} : vector<32x32xbf16>, vector<32x32xbf16>, vector<32x32xf32> -> vector<32x32xf32>
    %48 = arith.addf %6, %47 : vector<32x32xf32>
    %c0_26 = arith.constant 0 : index
    %c0_27 = arith.constant 0 : index
    %49 = vector.load %arg9[%c0_26, %c0_27] : memref<32x1xf32, #tpu.memory_space<vmem>>, vector<32x1xf32>
    %50 = vector.broadcast %49 : vector<32x1xf32> to vector<32x32xf32>
    %51 = arith.addf %48, %50 : vector<32x32xf32>
    %c0_28 = arith.constant 0 : index
    %c0_29 = arith.constant 0 : index
    %52 = vector.load %arg10[%c0_28, %c0_29] : memref<1x32xf32, #tpu.memory_space<vmem>>, vector<1x32xf32>
    %c0_30 = arith.constant 0 : index
    %c0_31 = arith.constant 0 : index
    %53 = vector.load %arg11[%c0_30, %c0_31] : memref<1x32xf32, #tpu.memory_space<vmem>>, vector<1x32xf32>
    %cst_32 = arith.constant dense<0.000000e+00> : vector<32xf32>
    %54 = vector.multi_reduction <add>, %51, %cst_32 [1] : vector<32x32xf32> to vector<32xf32>
    %55 = vector.shape_cast %54 : vector<32xf32> to vector<32x1xf32>
    %cst_33 = arith.constant 3.200000e+01 : f32
    %56 = vector.broadcast %cst_33 : f32 to vector<32x1xf32>
    %57 = arith.divf %55, %56 : vector<32x1xf32>
    %58 = vector.broadcast %57 : vector<32x1xf32> to vector<32x32xf32>
    %59 = arith.subf %51, %58 : vector<32x32xf32>
    %60 = arith.mulf %59, %59 : vector<32x32xf32>
    %cst_34 = arith.constant dense<0.000000e+00> : vector<32xf32>
    %61 = vector.multi_reduction <add>, %60, %cst_34 [1] : vector<32x32xf32> to vector<32xf32>
    %62 = vector.shape_cast %61 : vector<32xf32> to vector<32x1xf32>
    %cst_35 = arith.constant 3.200000e+01 : f32
    %63 = vector.broadcast %cst_35 : f32 to vector<32x1xf32>
    %64 = arith.divf %62, %63 : vector<32x1xf32>
    %65 = vector.broadcast %57 : vector<32x1xf32> to vector<32x32xf32>
    %66 = arith.subf %51, %65 : vector<32x32xf32>
    %cst_36 = arith.constant 9.99999974E-6 : f32
    %67 = vector.broadcast %cst_36 : f32 to vector<32x1xf32>
    %68 = arith.addf %64, %67 : vector<32x1xf32>
    %69 = math.rsqrt %68 : vector<32x1xf32>
    %70 = vector.broadcast %69 : vector<32x1xf32> to vector<32x32xf32>
    %71 = arith.mulf %66, %70 : vector<32x32xf32>
    %72 = vector.broadcast %52 : vector<1x32xf32> to vector<32x32xf32>
    %73 = arith.mulf %71, %72 : vector<32x32xf32>
    %74 = vector.broadcast %53 : vector<1x32xf32> to vector<32x32xf32>
    %75 = arith.addf %73, %74 : vector<32x32xf32>
    %c0_37 = arith.constant 0 : index
    %c0_38 = arith.constant 0 : index
    %76 = vector.load %arg12[%c0_37, %c0_38] : memref<32x64xbf16, #tpu.memory_space<vmem>>, vector<32x64xbf16>
    %77 = arith.truncf %75 : vector<32x32xf32> to vector<32x32xbf16>
    %cst_39 = arith.constant dense<0.000000e+00> : vector<32x64xf32>
    %78 = tpu.matmul %77, %76, %cst_39 {dimension_numbers = #tpu.dot_dimension_numbers<[1], [0], [0], [1], [0, 0, 1, 1], [], []>} : vector<32x32xbf16>, vector<32x64xbf16>, vector<32x64xf32> -> vector<32x64xf32>
    %c0_40 = arith.constant 0 : index
    %c0_41 = arith.constant 0 : index
    %79 = vector.load %arg13[%c0_40, %c0_41] : memref<1x64xf32, #tpu.memory_space<vmem>>, vector<1x64xf32>
    %80 = vector.broadcast %79 : vector<1x64xf32> to vector<32x64xf32>
    %81 = arith.addf %78, %80 : vector<32x64xf32>
    %cst_42 = arith.constant 5.000000e-01 : f32
    %82 = vector.broadcast %cst_42 : f32 to vector<32x64xf32>
    %83 = arith.mulf %82, %81 : vector<32x64xf32>
    %cst_43 = arith.constant 0.707106769 : f32
    %84 = vector.broadcast %cst_43 : f32 to vector<32x64xf32>
    %85 = arith.mulf %81, %84 : vector<32x64xf32>
    %86 = math.erf %85 : vector<32x64xf32>
    %cst_44 = arith.constant 1.000000e+00 : f32
    %87 = vector.broadcast %cst_44 : f32 to vector<32x64xf32>
    %88 = arith.addf %87, %86 : vector<32x64xf32>
    %89 = arith.mulf %83, %88 : vector<32x64xf32>
    %c0_45 = arith.constant 0 : index
    %c0_46 = arith.constant 0 : index
    %90 = vector.load %arg14[%c0_45, %c0_46] : memref<64x32xbf16, #tpu.memory_space<vmem>>, vector<64x32xbf16>
    %91 = arith.truncf %89 : vector<32x64xf32> to vector<32x64xbf16>
    %cst_47 = arith.constant dense<0.000000e+00> : vector<32x32xf32>
    %92 = tpu.matmul %91, %90, %cst_47 {dimension_numbers = #tpu.dot_dimension_numbers<[1], [0], [0], [1], [0, 0, 1, 1], [], []>} : vector<32x64xbf16>, vector<64x32xbf16>, vector<32x32xf32> -> vector<32x32xf32>
    %93 = arith.addf %51, %92 : vector<32x32xf32>
    %c0_48 = arith.constant 0 : index
    %c0_49 = arith.constant 0 : index
    %94 = vector.load %arg15[%c0_48, %c0_49] : memref<1x32xf32, #tpu.memory_space<vmem>>, vector<1x32xf32>
    %95 = vector.broadcast %94 : vector<1x32xf32> to vector<32x32xf32>
    %96 = arith.addf %93, %95 : vector<32x32xf32>
    %c0_50 = arith.constant 0 : index
    %c0_51 = arith.constant 0 : index
    %97 = vector.load %arg16[%c0_50, %c0_51] : memref<1x32xf32, #tpu.memory_space<vmem>>, vector<1x32xf32>
    %c0_52 = arith.constant 0 : index
    %c0_53 = arith.constant 0 : index
    %98 = vector.load %arg17[%c0_52, %c0_53] : memref<1x32xf32, #tpu.memory_space<vmem>>, vector<1x32xf32>
    %cst_54 = arith.constant dense<0.000000e+00> : vector<32xf32>
    %99 = vector.multi_reduction <add>, %96, %cst_54 [1] : vector<32x32xf32> to vector<32xf32>
    %100 = vector.shape_cast %99 : vector<32xf32> to vector<32x1xf32>
    %cst_55 = arith.constant 3.200000e+01 : f32
    %101 = vector.broadcast %cst_55 : f32 to vector<32x1xf32>
    %102 = arith.divf %100, %101 : vector<32x1xf32>
    %103 = vector.broadcast %102 : vector<32x1xf32> to vector<32x32xf32>
    %104 = arith.subf %96, %103 : vector<32x32xf32>
    %105 = arith.mulf %104, %104 : vector<32x32xf32>
    %cst_56 = arith.constant dense<0.000000e+00> : vector<32xf32>
    %106 = vector.multi_reduction <add>, %105, %cst_56 [1] : vector<32x32xf32> to vector<32xf32>
    %107 = vector.shape_cast %106 : vector<32xf32> to vector<32x1xf32>
    %cst_57 = arith.constant 3.200000e+01 : f32
    %108 = vector.broadcast %cst_57 : f32 to vector<32x1xf32>
    %109 = arith.divf %107, %108 : vector<32x1xf32>
    %110 = vector.broadcast %102 : vector<32x1xf32> to vector<32x32xf32>
    %111 = arith.subf %96, %110 : vector<32x32xf32>
    %cst_58 = arith.constant 9.99999974E-6 : f32
    %112 = vector.broadcast %cst_58 : f32 to vector<32x1xf32>
    %113 = arith.addf %109, %112 : vector<32x1xf32>
    %114 = math.rsqrt %113 : vector<32x1xf32>
    %115 = vector.broadcast %114 : vector<32x1xf32> to vector<32x32xf32>
    %116 = arith.mulf %111, %115 : vector<32x32xf32>
    %117 = vector.broadcast %97 : vector<1x32xf32> to vector<32x32xf32>
    %118 = arith.mulf %116, %117 : vector<32x32xf32>
    %119 = vector.broadcast %98 : vector<1x32xf32> to vector<32x32xf32>
    %120 = arith.addf %118, %119 : vector<32x32xf32>
    %c0_59 = arith.constant 0 : index
    %c0_60 = arith.constant 0 : index
    %121 = vector.load %arg18[%c0_59, %c0_60] : memref<32x32xbf16, #tpu.memory_space<vmem>>, vector<32x32xbf16>
    %122 = arith.truncf %120 : vector<32x32xf32> to vector<32x32xbf16>
    %cst_61 = arith.constant dense<0.000000e+00> : vector<32x32xf32>
    %123 = tpu.matmul %121, %122, %cst_61 {dimension_numbers = #tpu.dot_dimension_numbers<[1], [0], [0], [1], [0, 0, 1, 1], [], []>} : vector<32x32xbf16>, vector<32x32xbf16>, vector<32x32xf32> -> vector<32x32xf32>
    %c0_62 = arith.constant 0 : index
    %c0_63 = arith.constant 0 : index
    %124 = vector.load %arg19[%c0_62, %c0_63] : memref<32x1xf32, #tpu.memory_space<vmem>>, vector<32x1xf32>
    %125 = vector.broadcast %124 : vector<32x1xf32> to vector<32x32xf32>
    %126 = arith.addf %123, %125 : vector<32x32xf32>
    %cst_64 = arith.constant 5.000000e-01 : f32
    %127 = vector.broadcast %cst_64 : f32 to vector<32x32xf32>
    %128 = arith.mulf %127, %126 : vector<32x32xf32>
    %cst_65 = arith.constant 0.707106769 : f32
    %129 = vector.broadcast %cst_65 : f32 to vector<32x32xf32>
    %130 = arith.mulf %126, %129 : vector<32x32xf32>
    %131 = math.erf %130 : vector<32x32xf32>
    %cst_66 = arith.constant 1.000000e+00 : f32
    %132 = vector.broadcast %cst_66 : f32 to vector<32x32xf32>
    %133 = arith.addf %132, %131 : vector<32x32xf32>
    %134 = arith.mulf %128, %133 : vector<32x32xf32>
    %c0_67 = arith.constant 0 : index
    %c0_68 = arith.constant 0 : index
    %135 = vector.load %arg20[%c0_67, %c0_68] : memref<32x32xbf16, #tpu.memory_space<vmem>>, vector<32x32xbf16>
    %136 = arith.truncf %134 : vector<32x32xf32> to vector<32x32xbf16>
    %cst_69 = arith.constant dense<0.000000e+00> : vector<32x32xf32>
    %137 = tpu.matmul %135, %136, %cst_69 {dimension_numbers = #tpu.dot_dimension_numbers<[1], [0], [0], [1], [0, 0, 1, 1], [], []>} : vector<32x32xbf16>, vector<32x32xbf16>, vector<32x32xf32> -> vector<32x32xf32>
    %138 = arith.addf %96, %137 : vector<32x32xf32>
    %c0_70 = arith.constant 0 : index
    %c0_71 = arith.constant 0 : index
    %139 = vector.load %arg21[%c0_70, %c0_71] : memref<32x1xf32, #tpu.memory_space<vmem>>, vector<32x1xf32>
    %140 = vector.broadcast %139 : vector<32x1xf32> to vector<32x32xf32>
    %141 = arith.addf %138, %140 : vector<32x32xf32>
    %c0_72 = arith.constant 0 : index
    %c0_73 = arith.constant 0 : index
    %142 = vector.load %arg22[%c0_72, %c0_73] : memref<1x32xf32, #tpu.memory_space<vmem>>, vector<1x32xf32>
    %c0_74 = arith.constant 0 : index
    %c0_75 = arith.constant 0 : index
    %143 = vector.load %arg23[%c0_74, %c0_75] : memref<1x32xf32, #tpu.memory_space<vmem>>, vector<1x32xf32>
    %cst_76 = arith.constant dense<0.000000e+00> : vector<32xf32>
    %144 = vector.multi_reduction <add>, %141, %cst_76 [1] : vector<32x32xf32> to vector<32xf32>
    %145 = vector.shape_cast %144 : vector<32xf32> to vector<32x1xf32>
    %cst_77 = arith.constant 3.200000e+01 : f32
    %146 = vector.broadcast %cst_77 : f32 to vector<32x1xf32>
    %147 = arith.divf %145, %146 : vector<32x1xf32>
    %148 = vector.broadcast %147 : vector<32x1xf32> to vector<32x32xf32>
    %149 = arith.subf %141, %148 : vector<32x32xf32>
    %150 = arith.mulf %149, %149 : vector<32x32xf32>
    %cst_78 = arith.constant dense<0.000000e+00> : vector<32xf32>
    %151 = vector.multi_reduction <add>, %150, %cst_78 [1] : vector<32x32xf32> to vector<32xf32>
    %152 = vector.shape_cast %151 : vector<32xf32> to vector<32x1xf32>
    %cst_79 = arith.constant 3.200000e+01 : f32
    %153 = vector.broadcast %cst_79 : f32 to vector<32x1xf32>
    %154 = arith.divf %152, %153 : vector<32x1xf32>
    %155 = vector.broadcast %147 : vector<32x1xf32> to vector<32x32xf32>
    %156 = arith.subf %141, %155 : vector<32x32xf32>
    %cst_80 = arith.constant 9.99999974E-6 : f32
    %157 = vector.broadcast %cst_80 : f32 to vector<32x1xf32>
    %158 = arith.addf %154, %157 : vector<32x1xf32>
    %159 = math.rsqrt %158 : vector<32x1xf32>
    %160 = vector.broadcast %159 : vector<32x1xf32> to vector<32x32xf32>
    %161 = arith.mulf %156, %160 : vector<32x32xf32>
    %162 = vector.broadcast %142 : vector<1x32xf32> to vector<32x32xf32>
    %163 = arith.mulf %161, %162 : vector<32x32xf32>
    %164 = vector.broadcast %143 : vector<1x32xf32> to vector<32x32xf32>
    %165 = arith.addf %163, %164 : vector<32x32xf32>
    %c0_81 = arith.constant 0 : index
    %c0_82 = arith.constant 0 : index
    %166 = vector.load %arg24[%c0_81, %c0_82] : memref<32x64xbf16, #tpu.memory_space<vmem>>, vector<32x64xbf16>
    %167 = arith.truncf %165 : vector<32x32xf32> to vector<32x32xbf16>
    %cst_83 = arith.constant dense<0.000000e+00> : vector<32x64xf32>
    %168 = tpu.matmul %167, %166, %cst_83 {dimension_numbers = #tpu.dot_dimension_numbers<[1], [0], [0], [1], [0, 0, 1, 1], [], []>} : vector<32x32xbf16>, vector<32x64xbf16>, vector<32x64xf32> -> vector<32x64xf32>
    %c0_84 = arith.constant 0 : index
    %c0_85 = arith.constant 0 : index
    %169 = vector.load %arg25[%c0_84, %c0_85] : memref<1x64xf32, #tpu.memory_space<vmem>>, vector<1x64xf32>
    %170 = vector.broadcast %169 : vector<1x64xf32> to vector<32x64xf32>
    %171 = arith.addf %168, %170 : vector<32x64xf32>
    %cst_86 = arith.constant 5.000000e-01 : f32
    %172 = vector.broadcast %cst_86 : f32 to vector<32x64xf32>
    %173 = arith.mulf %172, %171 : vector<32x64xf32>
    %cst_87 = arith.constant 0.707106769 : f32
    %174 = vector.broadcast %cst_87 : f32 to vector<32x64xf32>
    %175 = arith.mulf %171, %174 : vector<32x64xf32>
    %176 = math.erf %175 : vector<32x64xf32>
    %cst_88 = arith.constant 1.000000e+00 : f32
    %177 = vector.broadcast %cst_88 : f32 to vector<32x64xf32>
    %178 = arith.addf %177, %176 : vector<32x64xf32>
    %179 = arith.mulf %173, %178 : vector<32x64xf32>
    %c0_89 = arith.constant 0 : index
    %c0_90 = arith.constant 0 : index
    %180 = vector.load %arg26[%c0_89, %c0_90] : memref<64x32xbf16, #tpu.memory_space<vmem>>, vector<64x32xbf16>
    %181 = arith.truncf %179 : vector<32x64xf32> to vector<32x64xbf16>
    %cst_91 = arith.constant dense<0.000000e+00> : vector<32x32xf32>
    %182 = tpu.matmul %181, %180, %cst_91 {dimension_numbers = #tpu.dot_dimension_numbers<[1], [0], [0], [1], [0, 0, 1, 1], [], []>} : vector<32x64xbf16>, vector<64x32xbf16>, vector<32x32xf32> -> vector<32x32xf32>
    %183 = arith.addf %141, %182 : vector<32x32xf32>
    %c0_92 = arith.constant 0 : index
    %c0_93 = arith.constant 0 : index
    %184 = vector.load %arg27[%c0_92, %c0_93] : memref<1x32xf32, #tpu.memory_space<vmem>>, vector<1x32xf32>
    %185 = vector.broadcast %184 : vector<1x32xf32> to vector<32x32xf32>
    %186 = arith.addf %183, %185 : vector<32x32xf32>
    %c0_94 = arith.constant 0 : index
    %c0_95 = arith.constant 0 : index
    %187 = vector.load %arg28[%c0_94, %c0_95] : memref<1x32xf32, #tpu.memory_space<vmem>>, vector<1x32xf32>
    %c0_96 = arith.constant 0 : index
    %c0_97 = arith.constant 0 : index
    %188 = vector.load %arg29[%c0_96, %c0_97] : memref<1x32xf32, #tpu.memory_space<vmem>>, vector<1x32xf32>
    %cst_98 = arith.constant dense<0.000000e+00> : vector<32xf32>
    %189 = vector.multi_reduction <add>, %186, %cst_98 [1] : vector<32x32xf32> to vector<32xf32>
    %190 = vector.shape_cast %189 : vector<32xf32> to vector<32x1xf32>
    %cst_99 = arith.constant 3.200000e+01 : f32
    %191 = vector.broadcast %cst_99 : f32 to vector<32x1xf32>
    %192 = arith.divf %190, %191 : vector<32x1xf32>
    %193 = vector.broadcast %192 : vector<32x1xf32> to vector<32x32xf32>
    %194 = arith.subf %186, %193 : vector<32x32xf32>
    %195 = arith.mulf %194, %194 : vector<32x32xf32>
    %cst_100 = arith.constant dense<0.000000e+00> : vector<32xf32>
    %196 = vector.multi_reduction <add>, %195, %cst_100 [1] : vector<32x32xf32> to vector<32xf32>
    %197 = vector.shape_cast %196 : vector<32xf32> to vector<32x1xf32>
    %cst_101 = arith.constant 3.200000e+01 : f32
    %198 = vector.broadcast %cst_101 : f32 to vector<32x1xf32>
    %199 = arith.divf %197, %198 : vector<32x1xf32>
    %200 = vector.broadcast %192 : vector<32x1xf32> to vector<32x32xf32>
    %201 = arith.subf %186, %200 : vector<32x32xf32>
    %cst_102 = arith.constant 9.99999974E-6 : f32
    %202 = vector.broadcast %cst_102 : f32 to vector<32x1xf32>
    %203 = arith.addf %199, %202 : vector<32x1xf32>
    %204 = math.rsqrt %203 : vector<32x1xf32>
    %205 = vector.broadcast %204 : vector<32x1xf32> to vector<32x32xf32>
    %206 = arith.mulf %201, %205 : vector<32x32xf32>
    %207 = vector.broadcast %187 : vector<1x32xf32> to vector<32x32xf32>
    %208 = arith.mulf %206, %207 : vector<32x32xf32>
    %209 = vector.broadcast %188 : vector<1x32xf32> to vector<32x32xf32>
    %210 = arith.addf %208, %209 : vector<32x32xf32>
    %c0_103 = arith.constant 0 : index
    %c0_104 = arith.constant 0 : index
    %211 = vector.load %arg32[%c0_103, %c0_104] : memref<2x32xf32, #tpu.memory_space<vmem>>, vector<2x32xf32>
    %cst_105 = arith.constant dense<0.000000e+00> : vector<2x32xf32>
    %212 = tpu.matmul %211, %210, %cst_105 {dimension_numbers = #tpu.dot_dimension_numbers<[1], [0], [0], [1], [0, 0, 1, 1], [], []>} : vector<2x32xf32>, vector<32x32xf32>, vector<2x32xf32> -> vector<2x32xf32>
    %c0_106 = arith.constant 0 : index
    %c0_107 = arith.constant 0 : index
    %213 = vector.load %arg30[%c0_106, %c0_107] : memref<32x128xbf16, #tpu.memory_space<vmem>>, vector<32x128xbf16>
    %214 = arith.truncf %212 : vector<2x32xf32> to vector<2x32xbf16>
    %cst_108 = arith.constant dense<0.000000e+00> : vector<2x128xf32>
    %215 = tpu.matmul %214, %213, %cst_108 {dimension_numbers = #tpu.dot_dimension_numbers<[1], [0], [0], [1], [0, 0, 1, 1], [], []>} : vector<2x32xbf16>, vector<32x128xbf16>, vector<2x128xf32> -> vector<2x128xf32>
    %c0_109 = arith.constant 0 : index
    %c0_110 = arith.constant 0 : index
    %216 = vector.load %arg31[%c0_109, %c0_110] : memref<1x128xf32, #tpu.memory_space<vmem>>, vector<1x128xf32>
    %217 = vector.broadcast %216 : vector<1x128xf32> to vector<2x128xf32>
    %218 = arith.addf %215, %217 : vector<2x128xf32>
    %c0_111 = arith.constant 0 : index
    %c0_112 = arith.constant 0 : index
    %c0_113 = arith.constant 0 : index
    %219 = vector.load %arg33[%c0_111, %c0_112, %c0_113] : memref<1x2x128xf32, #tpu.memory_space<vmem>>, vector<1x2x128xf32>
    %220 = vector.shape_cast %219 : vector<1x2x128xf32> to vector<2x128xf32>
    %221 = vector.shape_cast %218 : vector<2x128xf32> to vector<1x2x128xf32>
    tpu.vector_store %arg33[%c0_111, %c0_112, %c0_113], %221 {strides = array<i32>} : memref<1x2x128xf32, #tpu.memory_space<vmem>>, vector<1x2x128xf32>,
    return
  }
  func.func @transform_0(%arg0: i32) -> (i32, i32, i32) {
    %c0_i32 = arith.constant 0 : i32
    %c0_i32_0 = arith.constant 0 : i32
    %c0_i32_1 = arith.constant 0 : i32
    return %arg0, %c0_i32, %c0_i32_0 : i32, i32, i32
  }
  func.func @transform_1(%arg0: i32) -> (i32, i32) {
    %c0_i32 = arith.constant 0 : i32
    %c0_i32_0 = arith.constant 0 : i32
    %c0_i32_1 = arith.constant 0 : i32
    return %c0_i32, %c0_i32_0 : i32, i32
  }
  func.func @transform_2(%arg0: i32) -> (i32, i32) {
    %c0_i32 = arith.constant 0 : i32
    %c0_i32_0 = arith.constant 0 : i32
    %c0_i32_1 = arith.constant 0 : i32
    return %c0_i32, %c0_i32_0 : i32, i32
  }
  func.func @transform_3(%arg0: i32) -> (i32, i32) {
    %c0_i32 = arith.constant 0 : i32
    %c0_i32_0 = arith.constant 0 : i32
    %c0_i32_1 = arith.constant 0 : i32
    return %c0_i32, %c0_i32_0 : i32, i32
  }
  func.func @transform_4(%arg0: i32) -> (i32, i32) {
    %c0_i32 = arith.constant 0 : i32
    %c0_i32_0 = arith.constant 0 : i32
    %c0_i32_1 = arith.constant 0 : i32
    return %c0_i32, %c0_i32_0 : i32, i32
  }
  func.func @transform_5(%arg0: i32) -> (i32, i32) {
    %c0_i32 = arith.constant 0 : i32
    %c0_i32_0 = arith.constant 0 : i32
    %c0_i32_1 = arith.constant 0 : i32
    return %c0_i32, %c0_i32_0 : i32, i32
  }
  func.func @transform_6(%arg0: i32) -> (i32, i32) {
    %c0_i32 = arith.constant 0 : i32
    %c0_i32_0 = arith.constant 0 : i32
    %c0_i32_1 = arith.constant 0 : i32
    return %c0_i32, %c0_i32_0 : i32, i32
  }
  func.func @transform_7(%arg0: i32) -> (i32, i32) {
    %c0_i32 = arith.constant 0 : i32
    %c0_i32_0 = arith.constant 0 : i32
    %c0_i32_1 = arith.constant 0 : i32
    return %c0_i32, %c0_i32_0 : i32, i32
  }
  func.func @transform_8(%arg0: i32) -> (i32, i32) {
    %c0_i32 = arith.constant 0 : i32
    %c0_i32_0 = arith.constant 0 : i32
    %c0_i32_1 = arith.constant 0 : i32
    return %c0_i32, %c0_i32_0 : i32, i32
  }
  func.func @transform_9(%arg0: i32) -> (i32, i32) {
    %c0_i32 = arith.constant 0 : i32
    %c0_i32_0 = arith.constant 0 : i32
    %c0_i32_1 = arith.constant 0 : i32
    return %c0_i32, %c0_i32_0 : i32, i32
  }
  func.func @transform_10(%arg0: i32) -> (i32, i32) {
    %c0_i32 = arith.constant 0 : i32
    %c0_i32_0 = arith.constant 0 : i32
    %c0_i32_1 = arith.constant 0 : i32
    return %c0_i32, %c0_i32_0 : i32, i32
  }
  func.func @transform_11(%arg0: i32) -> (i32, i32) {
    %c0_i32 = arith.constant 0 : i32
    %c0_i32_0 = arith.constant 0 : i32
    %c0_i32_1 = arith.constant 0 : i32
    return %c0_i32, %c0_i32_0 : i32, i32
  }
  func.func @transform_12(%arg0: i32) -> (i32, i32) {
    %c0_i32 = arith.constant 0 : i32
    %c0_i32_0 = arith.constant 0 : i32
    %c0_i32_1 = arith.constant 0 : i32
    return %c0_i32, %c0_i32_0 : i32, i32
  }
  func.func @transform_13(%arg0: i32) -> (i32, i32) {
    %c0_i32 = arith.constant 0 : i32
    %c0_i32_0 = arith.constant 0 : i32
    %c0_i32_1 = arith.constant 0 : i32
    return %c0_i32, %c0_i32_0 : i32, i32
  }
  func.func @transform_14(%arg0: i32) -> (i32, i32) {
    %c0_i32 = arith.constant 0 : i32
    %c0_i32_0 = arith.constant 0 : i32
    %c0_i32_1 = arith.constant 0 : i32
    return %c0_i32, %c0_i32_0 : i32, i32
  }
  func.func @transform_15(%arg0: i32) -> (i32, i32) {
    %c0_i32 = arith.constant 0 : i32
    %c0_i32_0 = arith.constant 0 : i32
    %c0_i32_1 = arith.constant 0 : i32
    return %c0_i32, %c0_i32_0 : i32, i32
  }
  func.func @transform_16(%arg0: i32) -> (i32, i32) {
    %c0_i32 = arith.constant 0 : i32
    %c0_i32_0 = arith.constant 0 : i32
    %c0_i32_1 = arith.constant 0 : i32
    return %c0_i32, %c0_i32_0 : i32, i32
  }
  func.func @transform_17(%arg0: i32) -> (i32, i32) {
    %c0_i32 = arith.constant 0 : i32
    %c0_i32_0 = arith.constant 0 : i32
    %c0_i32_1 = arith.constant 0 : i32
    return %c0_i32, %c0_i32_0 : i32, i32
  }
  func.func @transform_18(%arg0: i32) -> (i32, i32) {
    %c0_i32 = arith.constant 0 : i32
    %c0_i32_0 = arith.constant 0 : i32
    %c0_i32_1 = arith.constant 0 : i32
    return %c0_i32, %c0_i32_0 : i32, i32
  }
  func.func @transform_19(%arg0: i32) -> (i32, i32) {
    %c0_i32 = arith.constant 0 : i32
    %c0_i32_0 = arith.constant 0 : i32
    %c0_i32_1 = arith.constant 0 : i32
    return %c0_i32, %c0_i32_0 : i32, i32
  }
  func.func @transform_20(%arg0: i32) -> (i32, i32) {
    %c0_i32 = arith.constant 0 : i32
    %c0_i32_0 = arith.constant 0 : i32
    %c0_i32_1 = arith.constant 0 : i32
    return %c0_i32, %c0_i32_0 : i32, i32
  }
  func.func @transform_21(%arg0: i32) -> (i32, i32) {
    %c0_i32 = arith.constant 0 : i32
    %c0_i32_0 = arith.constant 0 : i32
    %c0_i32_1 = arith.constant 0 : i32
    return %c0_i32, %c0_i32_0 : i32, i32
  }
  func.func @transform_22(%arg0: i32) -> (i32, i32) {
    %c0_i32 = arith.constant 0 : i32
    %c0_i32_0 = arith.constant 0 : i32
    %c0_i32_1 = arith.constant 0 : i32
    return %c0_i32, %c0_i32_0 : i32, i32
  }
  func.func @transform_23(%arg0: i32) -> (i32, i32) {
    %c0_i32 = arith.constant 0 : i32
    %c0_i32_0 = arith.constant 0 : i32
    %c0_i32_1 = arith.constant 0 : i32
    return %c0_i32, %c0_i32_0 : i32, i32
  }
  func.func @transform_24(%arg0: i32) -> (i32, i32) {
    %c0_i32 = arith.constant 0 : i32
    %c0_i32_0 = arith.constant 0 : i32
    %c0_i32_1 = arith.constant 0 : i32
    return %c0_i32, %c0_i32_0 : i32, i32
  }
  func.func @transform_25(%arg0: i32) -> (i32, i32) {
    %c0_i32 = arith.constant 0 : i32
    %c0_i32_0 = arith.constant 0 : i32
    %c0_i32_1 = arith.constant 0 : i32
    return %c0_i32, %c0_i32_0 : i32, i32
  }
  func.func @transform_26(%arg0: i32) -> (i32, i32) {
    %c0_i32 = arith.constant 0 : i32
    %c0_i32_0 = arith.constant 0 : i32
    %c0_i32_1 = arith.constant 0 : i32
    return %c0_i32, %c0_i32_0 : i32, i32
  }
  func.func @transform_27(%arg0: i32) -> (i32, i32) {
    %c0_i32 = arith.constant 0 : i32
    %c0_i32_0 = arith.constant 0 : i32
    %c0_i32_1 = arith.constant 0 : i32
    return %c0_i32, %c0_i32_0 : i32, i32
  }
  func.func @transform_28(%arg0: i32) -> (i32, i32) {
    %c0_i32 = arith.constant 0 : i32
    %c0_i32_0 = arith.constant 0 : i32
    %c0_i32_1 = arith.constant 0 : i32
    return %c0_i32, %c0_i32_0 : i32, i32
  }
  func.func @transform_29(%arg0: i32) -> (i32, i32) {
    %c0_i32 = arith.constant 0 : i32
    %c0_i32_0 = arith.constant 0 : i32
    %c0_i32_1 = arith.constant 0 : i32
    return %c0_i32, %c0_i32_0 : i32, i32
  }
  func.func @transform_30(%arg0: i32) -> (i32, i32) {
    %c0_i32 = arith.constant 0 : i32
    %c0_i32_0 = arith.constant 0 : i32
    %c0_i32_1 = arith.constant 0 : i32
    return %c0_i32, %c0_i32_0 : i32, i32
  }
  func.func @transform_31(%arg0: i32) -> (i32, i32) {
    %c0_i32 = arith.constant 0 : i32
    %c0_i32_0 = arith.constant 0 : i32
    %c0_i32_1 = arith.constant 0 : i32
    return %c0_i32, %c0_i32_0 : i32, i32
  }
  func.func @transform_32(%arg0: i32) -> (i32, i32, i32) {
    %c0_i32 = arith.constant 0 : i32
    %c0_i32_0 = arith.constant 0 : i32
    %c0_i32_1 = arith.constant 0 : i32
    return %arg0, %c0_i32, %c0_i32_0 : i32, i32, i32
  }
}

</mosaic_0001>

<bundles_post_ra>
// kernel: mixer_forward.1
= control target key start
LH: loop header
LB: loop body
LE: loop exit
PB: predicated region body
PF: predicated region fallthrough
CT: control target
= control target key end

     0   :  { %s3013_s6 = smov 1   ;;  %s3014_s10 = smov 2   ;;  %s3508_s0 = inlined_call_operand.smem [shape: u32[33], index: -1, kind: input, shape index: {}] }
   0x1   :  { %s3057_s5 = sld [smem:[%s3508_s0]]   ;;  %s3015_s14 = smov 3  }
   0x2   :  { %s3062_s9 = sld [smem:[%s3508_s0 + %s3013_s6]]   ;;  %s3016_s18 = smov 4  }
   0x3   :  { %s3067_s13 = sld [smem:[%s3508_s0 + %s3014_s10]]   ;;  %s3017_s22 = smov 5  }
   0x4   :  { %s3072_s17 = sld [smem:[%s3508_s0 + %s3015_s14]]   ;;  %s3018_s26 = smov 6  }
   0x5   :  { %s3077_s21 = sld [smem:[%s3508_s0 + %s3016_s18]]   ;;  %s3019_s30 = smov 7  }
   0x6   :  { %s3082_s25 = sld [smem:[%s3508_s0 + %s3017_s22]]   ;;  %s3020_s4 = smov 8  }
   0x7   :  { %3524 = sst [smem:[#allocation5_spill]] %s3057_s5  ;;  %s3021_s10 = smov 9  }
   0x8   :  { %3525 = sst [smem:[#allocation6_spill]] %s3062_s9  ;;  %s3022_s15 = smov 10  }
   0x9   :  { %s3087_s29 = sld [smem:[%s3508_s0 + %s3018_s26]]   ;;  %s3023_s20 = smov 11  }
   0xa   :  { %s3092_s3 = sld [smem:[%s3508_s0 + %s3019_s30]]   ;;  %s3024_s26 = smov 12  }
   0xb   :  { %s3097_s8 = sld [smem:[%s3508_s0 + %s3020_s4]]   ;;  %s3025_s1 = smov 13  }
   0xc   :  { %s3102_s14 = sld [smem:[%s3508_s0 + %s3021_s10]]   ;;  %s3026_s7 = smov 14  }
   0xd   :  { %s3107_s19 = sld [smem:[%s3508_s0 + %s3022_s15]]   ;;  %s3027_s15 = smov 15  }
   0xe   :  { %s3112_s24 = sld [smem:[%s3508_s0 + %s3023_s20]]   ;;  %s3028_s22 = smov 16  }
   0xf   :  { %s3117_s30 = sld [smem:[%s3508_s0 + %s3024_s26]]   ;;  %s3029_s28 = smov 17  }
  0x10   :  { %3526 = sst [smem:[#allocation7_spill]] %s3092_s3 }
  0x11   :  { %3527 = sst [smem:[#allocation8_spill]] %s3097_s8 }
  0x12   :  { %s3122_s6 = sld [smem:[%s3508_s0 + %s3025_s1]]  }
  0x13   :  { %s3127_s12 = sld [smem:[%s3508_s0 + %s3026_s7]]   ;;  %s3030_s7 = smov 18  }
  0x14   :  { %s3132_s20 = sld [smem:[%s3508_s0 + %s3027_s15]]   ;;  %s3031_s15 = smov 19  }
  0x15   :  { %s3137_s27 = sld [smem:[%s3508_s0 + %s3028_s22]]   ;;  %s3032_s22 = smov 20  }
  0x16   :  { %s3142_s4 = sld [smem:[%s3508_s0 + %s3029_s28]]   ;;  %s3033_s28 = smov 21  }
  0x18   :  { %3528 = sst [smem:[#allocation9_spill]] %s3122_s6 }
  0x19   :  { %3529 = sst [smem:[#allocation10_spill]] %s3127_s12 }
  0x1a   :  { %3530 = sst [smem:[#allocation11_spill]] %s3132_s20 }
  0x1b   :  { %3531 = sst [smem:[#allocation12_spill]] %s3137_s27 }
  0x1c   :  { %3532 = sst [smem:[#allocation13_spill]] %s3142_s4 }
  0x1d   :  { %s3147_s12 = sld [smem:[%s3508_s0 + %s3030_s7]]   ;;  %s3034_s7 = smov 22  }
  0x1e   :  { %s3152_s20 = sld [smem:[%s3508_s0 + %s3031_s15]]   ;;  %s3035_s15 = smov 23  }
  0x1f   :  { %s3157_s27 = sld [smem:[%s3508_s0 + %s3032_s22]]   ;;  %s3036_s22 = smov 24  }
  0x20   :  { %s3162_s4 = sld [smem:[%s3508_s0 + %s3033_s28]]   ;;  %s3037_s28 = smov 25  }
  0x23   :  { %3533 = sst [smem:[#allocation14_spill]] %s3147_s12 }
  0x24   :  { %3534 = sst [smem:[#allocation15_spill]] %s3152_s20 }
  0x25   :  { %3535 = sst [smem:[#allocation16_spill]] %s3157_s27 }
  0x26   :  { %3536 = sst [smem:[#allocation17_spill]] %s3162_s4 }
  0x27   :  { %s3167_s12 = sld [smem:[%s3508_s0 + %s3034_s7]]   ;;  %s3038_s7 = smov 26  }
  0x28   :  { %s3172_s20 = sld [smem:[%s3508_s0 + %s3035_s15]]   ;;  %s3039_s15 = smov 27  }
  0x29   :  { %s3177_s27 = sld [smem:[%s3508_s0 + %s3036_s22]]   ;;  %s3040_s22 = smov 28  }
  0x2a   :  { %s3182_s4 = sld [smem:[%s3508_s0 + %s3037_s28]]   ;;  %s3041_s28 = smov 29  }
  0x2d   :  { %3537 = sst [smem:[#allocation18_spill]] %s3167_s12 }
  0x2e   :  { %3538 = sst [smem:[#allocation19_spill]] %s3172_s20 }
  0x2f   :  { %3539 = sst [smem:[#allocation20_spill]] %s3177_s27 }
  0x30   :  { %3540 = sst [smem:[#allocation21_spill]] %s3182_s4 }
  0x31   :  { %s3187_s12 = sld [smem:[%s3508_s0 + %s3038_s7]]   ;;  %s3042_s7 = smov 30  }
  0x32   :  { %s3192_s20 = sld [smem:[%s3508_s0 + %s3039_s15]]   ;;  %s3043_s15 = smov 31  }
  0x33   :  { %s3197_s27 = sld [smem:[%s3508_s0 + %s3040_s22]]   ;;  %s3044_s22 = smov 32  }
  0x34   :  { %s3202_s4 = sld [smem:[%s3508_s0 + %s3041_s28]]  }
  0x37   :  { %3541 = sst [smem:[#allocation22_spill]] %s3187_s12 }
  0x38   :  { %3542 = sst [smem:[#allocation23_spill]] %s3192_s20 }
  0x39   :  { %3543 = sst [smem:[#allocation24_spill]] %s3197_s27 }
  0x3a   :  { %3544 = sst [smem:[#allocation25_spill]] %s3202_s4 }
  0x3b   :  { %s3207_s12 = sld [smem:[%s3508_s0 + %s3042_s7]]  }
  0x3c   :  { %s3212_s20 = sld [smem:[%s3508_s0 + %s3043_s15]]  }
  0x3d   :  { %s3217_s27 = sld [smem:[%s3508_s0 + %s3044_s22]]  }
  0x41   :  { %3545 = sst [smem:[#allocation26_spill]] %s3207_s12 }
  0x42   :  { %70 = vsyncpa [#allocation3], 0 }
  0x43   :  { %72 = vsyncpa [#allocation3 + $0x1], 0  ;;  %s3219_s28 = smov 0   ;;  %s3221_s1 = smov 0  }
  0x44   :  { %s3223_s2 = smov 0   ;;  %s3225_s7 = smov 0  }
  0x45 LB: > { %s3546_s4 = sld [smem:[#allocation25_spill]]  ;;  %s3240_s0 = sadd.s32 4294967295, %s3011_s7   ;;  %s2999_s28 = sphi %s3219_s28, %s3570_s28   ;;  %s3011_s7 = sphi %s3225_s7, %s3573_s7   ;;  %s3007_s2 = sphi %s3223_s2, %s3572_s2   ;;  %s3003_s1 = sphi %s3221_s1, %s3571_s1  }
  0x46   : > { %s3547_s9 = sld [smem:[#allocation6_spill]]  ;;  %s2551_s10 = sadd.s32 4294967294, %s3011_s7  }
  0x47   : > { %s3548_s8 = sld [smem:[#allocation8_spill]]  ;;  %s3244_s11 = sadd.s32 1, %s3011_s7  }
  0x48   : > { %s3549_s6 = sld [smem:[#allocation9_spill]]  ;;  %s762_s15 = sadd.s32 1, %s3007_s2 }
  0x49   : > { %s3550_s3 = sld [smem:[#allocation7_spill]]  ;;  %s759_s16 = ssub.s32 %s3011_s7, %s3244_s11 }
  0x4a   : > { %p772_p0 = scmp.ne.s32.totalorder %s3007_s2, %s3003_s1  ;;  %p760_p1 = scmp.eq.s32.totalorder %s759_s16, 0 }
  0x4b   : > { %p773_p2 = scmp.eq.s32.totalorder %s3240_s0, 1  ;;  %p778_p3 = scmp.ne.s32.totalorder %s3003_s1, %s2999_s28 }
  0x4c   : > { %p779_p4 = scmp.eq.s32.totalorder %s2551_s10, 1  ;;  %p2554_p7 = scmp.ge.s32.totalorder %s3011_s7, 1 }
  0x4d   : > { %s3255_s18 = scalar_select %p760_p1, %s3007_s2, %s762_s15  }
  0x4e   : > { %p3257_p5 = por %p773_p2, %p772_p0  ;;  %p3261_p6 = por %p779_p4, %p778_p3 }
  0x4f   : > { %p898_p8 = scmp.lt.s32.totalorder %s3011_s7, 3 }
  0x51   : > { %p899_p9 = pnand %p2554_p7, %p898_p8 }
  0x52   : > { %s3553_s5 = sld [smem:[#allocation5_spill]] (!%p899_p9)  ;;  %p980_p10 = scmp.lt.s32.totalorder (!%p899_p9), %s3240_s0, 1 }
  0x53   : > { %902 = sbr.rel (%p899_p9) target bundleno = 4002 (0xfa2), region = 148  ;;  %s3554_s16 = sld [smem:[#allocation10_spill]] (!%p899_p9) }
  0x54   : > { %s3569_s12 = sld [smem:[#allocation26_spill]] (!%p899_p9) }
  0x58   : > { %v2852_v0 = vld [vmem:[%s3547_s9 + $0x10] sm:$0xff]   ;;  %v2853_v1 = vld [vmem:[%s3547_s9 + $0x8] sm:$0xff]   ;;  %s981_s26 = scalar_select %p980_p10, %s3240_s0, 1  ;;  %vm1031_vm0 = vcmask 392192   ;;  %v2854_v2 = vld [vmem:[%s3547_s9] sm:$0xff]   ;;  %vm1089_vm1 = vcmask 261120  }
  0x59   : > { %2675 = vmatprep.subr.bf16.mxu0 %v2852_v0  ;;  %v2558_v5 = vld [vmem:[%s3067_s13] ss:$0 sm:$0xff]  ;;  %v1172_v39 = vld [vmem:[%s3087_s29 + $0x18] sm:$0xff]  ;;  %v3045_v40 = vmov 0   ;;  %v1171_v41 = vld [vmem:[%s3087_s29 + $0x10] sm:$0xff]  ;;  %vm1589_vm2 = vcmask 523264  }
  0x5a   : > { %2676 = vmatpush3.bf16.msra.mxu0 %v2852_v0  ;;  %s2625_s10 = sshll.u32 %s981_s26, 4  ;;  %v2857_v38 = vld [vmem:[%s3082_s25] sm:$0xff]   ;;  %2851 = vset.pattern.permute.xlu1 %v3045_v40  ;;  %v1170_v43 = vld [vmem:[%s3087_s29 + $0x8] sm:$0xff]  ;;  %v1355_v46 = vld [vmem:[%s3548_s8 + $0x10] sm:$0xff]  ;;  %s3555_s26 = sld [smem:[#allocation14_spill]]  ;;  %vm3047_vm3 = vmmov 0  }
  0x5b   : > { %2677 = vmatprep.subr.bf16.mxu0 %v2853_v1  ;;  %s984_s15 = scalar_lea.vmem %s3553_s5, %s2625_s10  ;;  %2689 = vmatprep.mubr.msk.bf16.mxu1 %vm1089_vm1, %v2857_v38  ;;  %v1169_v42 = vld [vmem:[%s3087_s29] sm:$0xff]  ;;  %v1354_v45 = vld [vmem:[%s3548_s8 + $0x8] sm:$0xff]  ;;  %v1356_v47 = vld [vmem:[%s3548_s8 + $0x18] sm:$0xff]  ;;  %s3556_s10 = sld [smem:[#allocation16_spill]] }
  0x5c   : > { %v2855_v3 = vld [vmem:[%s984_s15] sm:$0xff]   ;;  %v2856_v4 = vld [vmem:[%s984_s15 + $0x8] sm:$0xff]   ;;  %2850 = vset.pattern.permute.xlu0 %v3045_v40  ;;  %s3557_s15 = sld [smem:[#allocation13_spill]] }
  0x5d   : > { %2681 = vmatprep.mubr.msk.bf16.mxu0 %vm1031_vm0, %v2855_v3  ;;  %v1353_v44 = vld [vmem:[%s3548_s8] sm:$0xff]  ;;  %s3560_s5 = sld [smem:[#allocation15_spill]] }
  0x5e   : > { %2678 = vmatpush3.bf16.msra.mxu0 %v2853_v1  ;;  %v2566_v62 = vld [vmem:[%s3072_s17] ss:$0 sm:$0xff] }
  0x5f   : > { %2679 = vmatprep.subr.bf16.mxu0 %v2854_v2 }
  0x62   : > { %2680 = vmatpush3.bf16.msra.mxu0 %v2854_v2 }
  0x65   : > { %2682 = vmatmul.mubr.msk.bf16.vlgmr.msra.gmra.mxu0 %vm1031_vm0, %v2856_v4  ;;  %v2567_v4 = vld [vmem:[%s3077_s21] ss:$0 sm:$0xff] }
 0x125   : > { %v2683_v6 = vpop.f32.mrf.mxu0 }
 0x126   : > { %v3274_v7 = vadd.f32 %v2683_v6, %v2558_v5 }
 0x127   : > { %v1072_v8 = vpop.f32.mrf.mxu0 }
 0x128   : > { %v3276_v9 = vadd.f32 %v2558_v5, %v1072_v8  ;;  %v1096_v10 = vsel %vm1089_vm1, %v3274_v7, 0.0 }
 0x129   : > { %1097 = vadd.xlane.f32.xlu0 %v1096_v10  ;;  %v2684_v11 = vpop.f32.mrf.mxu0 }
 0x12a   : > { %v3280_v12 = vadd.f32 %v2684_v11, %v2558_v5  ;;  %v1090_v13 = vsel %vm1089_vm1, %v3276_v9, 0.0 }
 0x12b   : > { %v1075_v14 = vpop.f32.mrf.mxu0  ;;  %1091 = vadd.xlane.f32.xlu1 %v1090_v13 }
 0x12c   : > { %v3284_v15 = vadd.f32 %v2558_v5, %v1075_v14  ;;  %v1099_v16 = vsel %vm1089_vm1, %v3280_v12, 0.0 }
 0x12d   : > { %1100 = vadd.xlane.f32.xlu0 %v1099_v16 }
 0x12e   : > { %v1093_v17 = vsel %vm1089_vm1, %v3284_v15, 0.0 }
 0x12f   : > { %1094 = vadd.xlane.f32.xlu1 %v1093_v17 }
 0x1b2   : > { %v1098_v18 = vpop.xlane.xlu0 %1097 }
 0x1b3   : > { %v1105_v19 = vmul.f32 0.03125, %v1098_v18 }
 0x1b4   : > { %v1092_v20 = vpop.xlane.xlu1 %1091 }
 0x1b5   : > { %v1109_v21 = vsub.f32 %v3274_v7, %v1105_v19  ;;  %v1103_v22 = vmul.f32 0.03125, %v1092_v20  ;;  %v2858_v20 = vld [vmem:[%s3082_s25 + $0x8] sm:$0xff]  }
 0x1b6   : > { %v1101_v23 = vpop.xlane.xlu0 %1100 }
 0x1b7   : > { %v1107_v24 = vsub.f32 %v3276_v9, %v1103_v22  ;;  %v1106_v25 = vmul.f32 0.03125, %v1101_v23  ;;  %v1113_v26 = vmul.f32 %v1109_v21, %v1109_v21 }
 0x1b8   : > { %v1095_v27 = vpop.xlane.xlu1 %1094 }
 0x1b9   : > { %v1110_v28 = vsub.f32 %v3280_v12, %v1106_v25  ;;  %v1104_v29 = vmul.f32 0.03125, %v1095_v27  ;;  %v1121_v30 = vsel %vm1089_vm1, %v1113_v26, 0.0  ;;  %v1111_v31 = vmul.f32 %v1107_v24, %v1107_v24 }
 0x1ba   : > { %1122 = vadd.xlane.f32.xlu0 %v1121_v30 }
 0x1bb   : > { %v1108_v32 = vsub.f32 %v3284_v15, %v1104_v29  ;;  %v1114_v33 = vmul.f32 %v1110_v28, %v1110_v28  ;;  %v1115_v35 = vsel %vm1089_vm1, %v1111_v31, 0.0 }
 0x1bd   : > { %v1124_v34 = vsel %vm1089_vm1, %v1114_v33, 0.0  ;;  %v1112_v36 = vmul.f32 %v1108_v32, %v1108_v32 }
 0x1be   : > { %1125 = vadd.xlane.f32.xlu1 %v1124_v34  ;;  %1116 = vadd.xlane.f32.xlu0 %v1115_v35 }
 0x1bf   : > { %v1118_v37 = vsel %vm1089_vm1, %v1112_v36, 0.0 }
 0x1c2   : > { %1119 = vadd.xlane.f32.xlu1 %v1118_v37 }
 0x1d3   : > { %1190 = vperm.xlu1 %2851, %v1172_v39  }
 0x1d4   : > { %1185 = vperm.xlu0 %2850, %v1171_v41  }
 0x1d7   : > { %1175 = vperm.xlu1 %2851, %v1169_v42  }
 0x1db   : > { %1180 = vperm.xlu1 %2851, %v1170_v43  }
 0x1df   : > { %1359 = vperm.xlu1 %2851, %v1353_v44  }
 0x1e3   : > { %1364 = vperm.xlu1 %2851, %v1354_v45  }
 0x1e7   : > { %1369 = vperm.xlu1 %2851, %v1355_v46  }
 0x1eb   : > { %1374 = vperm.xlu1 %2851, %v1356_v47  }
 0x243   : > { %v1123_v48 = vpop.xlane.xlu0 %1122 }
 0x244   : > { %v1129_v49 = vmul.f32 0.03125, %v1123_v48 }
 0x246   : > { %v1133_v50 = vadd.f32 1e-05, %v1129_v49 }
 0x247   : > { %v1117_v51 = vpop.xlane.xlu0 %1116  ;;  %v1126_v52 = vpop.xlane.xlu1 %1125 }
 0x248   : > { %2879 = vrsqrt.f32 %v1133_v50  ;;  %v1127_v53 = vmul.f32 0.03125, %v1117_v51  ;;  %v1130_v54 = vmul.f32 0.03125, %v1126_v52 }
 0x24a   : > { %v1131_v55 = vadd.f32 1e-05, %v1127_v53  ;;  %v1134_v56 = vadd.f32 1e-05, %v1130_v54 }
 0x24b   : > { %v1120_v57 = vpop.xlane.xlu1 %1119 }
 0x24c   : > { %2881 = vrsqrt.f32 %v1131_v55  ;;  %v1128_v58 = vmul.f32 0.03125, %v1120_v57 }
 0x24d   : > { %2883 = vrsqrt.f32 %v1134_v56  ;;  %v2860_v56 = vld [vmem:[%s3550_s3 + $0x8] sm:$0xff]  }
 0x24e   : > { %v1132_v59 = vadd.f32 1e-05, %v1128_v58 }
 0x24f   : > { %v1191_v22 = vpop.permute.xlu1 %1190  ;;  %v1186_v23 = vpop.permute.xlu0 %1185 }
 0x250   : > { %2885 = vrsqrt.f32 %v1132_v59 }
 0x255   : > { %v2880_v60 = vpop.eup %2879 }
 0x256   : > { %v1141_v61 = vmul.f32 %v2880_v60, %v1109_v21  ;;  %v2859_v21 = vld [vmem:[%s3550_s3] sm:$0xff]   ;;  %s3559_s3 = sld [smem:[#allocation12_spill]] }
 0x258   : > { %v1151_v3 = vmul.f32 %v2566_v62, %v1141_v61 }
 0x259   : > { %v2882_v63 = vpop.eup %2881 }
 0x25a   : > { %v2884_v0 = vpop.eup %2883  ;;  %v1139_v1 = vmul.f32 %v2882_v63, %v1107_v24  ;;  %v1161_v11 = vadd.f32 %v2567_v4, %v1151_v3  ;;  %v1176_v24 = vpop.permute.xlu1 %1175 }
 0x25b   : > { %v1142_v2 = vmul.f32 %v2884_v0, %v1110_v28 }
 0x25c   : > { %v1149_v10 = vmul.f32 %v2566_v62, %v1139_v1 }
 0x25d   : > { %v2886_v5 = vpop.eup %2885  ;;  %v1152_v6 = vmul.f32 %v2566_v62, %v1142_v2 }
 0x25e   : > { %v1140_v8 = vmul.f32 %v2886_v5, %v1108_v32  ;;  %v1159_v17 = vadd.f32 %v2567_v4, %v1149_v10  ;;  %v1181_v33 = vpop.permute.xlu1 %1180 }
 0x25f   : > { %v1162_v13 = vadd.f32 %v2567_v4, %v1152_v6 }
 0x260   : > { %v1150_v14 = vmul.f32 %v2566_v62, %v1140_v8 }
 0x261   : > { %v1168_v16 = vpack.c.bf16 %v1162_v13, %v1161_v11 }
 0x262   : > { %v1160_v18 = vadd.f32 %v2567_v4, %v1150_v14  ;;  %v1360_v57 = vpop.permute.xlu1 %1359 }
 0x263   : > { %2685 = vmatprep.subr.bf16.mxu1 %v1168_v16 }
 0x264   : > { %2686 = vmatpush3.bf16.msra.mxu1 %v1168_v16  ;;  %v1167_v19 = vpack.c.bf16 %v1160_v18, %v1159_v17 }
 0x266   : > { %2687 = vmatprep.subr.bf16.mxu1 %v1167_v19  ;;  %v1365_v58 = vpop.permute.xlu1 %1364 }
 0x268   : > { %2688 = vmatpush3.bf16.msra.mxu1 %v1167_v19 }
 0x26a   : > { %v1370_v59 = vpop.permute.xlu1 %1369 }
 0x26b   : > { %2690 = vmatmul.mubr.msk.bf16.vlgmr.msra.gmra.mxu1 %vm1089_vm1, %v2858_v20 }
 0x26c   : > { %2697 = vmatprep.mubr.msk.bf16.mxu1 %vm1089_vm1, %v2859_v21 }
 0x26e   : > { %v1375_v2 = vpop.permute.xlu1 %1374 }
 0x32b   : > { %v2691_v25 = vpop.f32.mrf.mxu1 }
 0x32c   : > { %v1252_v26 = vadd.f32 %v2691_v25, %v1186_v23 }
 0x32d   : > { %v1243_v27 = vpop.f32.mrf.mxu1 }
 0x32e   : > { %v1264_v28 = vmul.f32 0.70710677, %v1252_v26  ;;  %v1244_v29 = vadd.f32 %v1243_v27, %v1176_v24  ;;  %v1260_v42 = vmul.f32 0.5, %v1252_v26 }
 0x32f   : > { %v2692_v30 = vpop.f32.mrf.mxu1 }
 0x330   : > { %2887 = verf.f32 %v1264_v28  ;;  %v1262_v31 = vmul.f32 0.70710677, %v1244_v29  ;;  %v1255_v32 = vadd.f32 %v2692_v30, %v1191_v22  ;;  %v1258_v47 = vmul.f32 0.5, %v1244_v29 }
 0x331   : > { %v1246_v34 = vpop.f32.mrf.mxu1 }
 0x332   : > { %2889 = verf.f32 %v1262_v31  ;;  %v1265_v35 = vmul.f32 0.70710677, %v1255_v32  ;;  %v1247_v36 = vadd.f32 %v1246_v34, %v1181_v33  ;;  %v1261_v44 = vmul.f32 0.5, %v1255_v32  ;;  %v2861_v33 = vld [vmem:[%s3112_s24 + $0x8] sm:$0xff]   ;;  %v2862_v34 = vld [vmem:[%s3112_s24] sm:$0xff]  }
 0x333   : > { %2701 = vmatprep.subr.bf16.mxu0 %v2861_v33 }
 0x334   : > { %2891 = verf.f32 %v1265_v35  ;;  %v1263_v37 = vmul.f32 0.70710677, %v1247_v36  ;;  %v1259_v50 = vmul.f32 0.5, %v1247_v36  ;;  %2702 = vmatpush3.bf16.msra.mxu0 %v2861_v33 }
 0x335   : > { %2703 = vmatprep.subr.bf16.mxu0 %v2862_v34 }
 0x336   : > { %2893 = verf.f32 %v1263_v37 }
 0x338   : > { %2704 = vmatpush3.bf16.msra.mxu0 %v2862_v34 }
 0x33d   : > { %v2888_v38 = vpop.eup %2887 }
 0x33e   : > { %v1272_v40 = vadd.f32 1.0, %v2888_v38 }
 0x33f   : > { %v2890_v39 = vpop.eup %2889 }
 0x340   : > { %v1270_v43 = vadd.f32 1.0, %v2890_v39  ;;  %v1276_v48 = vmul.f32 %v1272_v40, %v1260_v42 }
 0x341   : > { %v2892_v41 = vpop.eup %2891 }
 0x342   : > { %v1273_v45 = vadd.f32 1.0, %v2892_v41  ;;  %v1274_v52 = vmul.f32 %v1270_v43, %v1258_v47 }
 0x343   : > { %v2894_v46 = vpop.eup %2893 }
 0x344   : > { %v1277_v49 = vmul.f32 %v1273_v45, %v1261_v44  ;;  %v1271_v51 = vadd.f32 1.0, %v2894_v46 }
 0x346   : > { %v1275_v53 = vmul.f32 %v1271_v51, %v1259_v50  ;;  %v1283_v54 = vpack.c.bf16 %v1277_v49, %v1276_v48  ;;  %v2576_v49 = vld [vmem:[%s3102_s14] ss:$0 sm:$0xff] }
 0x348   : > { %2693 = vmatprep.subr.bf16.mxu1 %v1283_v54  ;;  %v1282_v55 = vpack.c.bf16 %v1275_v53, %v1274_v52  ;;  %v2577_v53 = vld [vmem:[%s3107_s19] ss:$0 sm:$0xff] }
 0x349   : > { %2694 = vmatpush3.bf16.msra.mxu1 %v1283_v54 }
 0x34a   : > { %2695 = vmatprep.subr.bf16.mxu1 %v1282_v55 }
 0x34d   : > { %2696 = vmatpush3.bf16.msra.mxu1 %v1282_v55 }
 0x350   : > { %2698 = vmatmul.mubr.msk.bf16.vlgmr.msra.gmra.mxu1 %vm1089_vm1, %v2860_v56 }
 0x410   : > { %v2699_v60 = vpop.f32.mrf.mxu1 }
 0x411   : > { %v1351_v4 = vadd.f32 %v2699_v60, %v3274_v7 }
 0x412   : > { %v1334_v61 = vpop.f32.mrf.mxu1 }
 0x413   : > { %v1349_v62 = vadd.f32 %v1334_v61, %v3276_v9  ;;  %v3328_v9 = vadd.f32 %v1370_v59, %v1351_v4  ;;  %v2863_v4 = vld [vmem:[%s3549_s6 + $0x18] sm:$0xff]  }
 0x414   : > { %v2700_v63 = vpop.f32.mrf.mxu1  ;;  %2709 = vmatprep.subr.bf16.mxu1 %v2863_v4 }
 0x415   : > { %v3317_v0 = vadd.f32 %v1360_v57, %v1349_v62  ;;  %v1352_v1 = vadd.f32 %v2700_v63, %v3280_v12  ;;  %v1389_v7 = vsel %vm1089_vm1, %v3328_v9, 0.0  ;;  %2710 = vmatpush3.bf16.msra.mxu1 %v2863_v4 }
 0x416   : > { %v1337_v3 = vpop.f32.mrf.mxu1 }
 0x417   : > { %v3321_v5 = vadd.f32 %v1375_v2, %v1352_v1  ;;  %v1350_v6 = vadd.f32 %v1337_v3, %v3284_v15  ;;  %v1383_v8 = vsel %vm1089_vm1, %v3317_v0, 0.0 }
 0x418   : > { %1384 = vadd.xlane.f32.xlu1 %v1383_v8  ;;  %v2865_v8 = vld [vmem:[%s3549_s6 + $0x8] sm:$0xff]  }
 0x419   : > { %v3326_v10 = vadd.f32 %v1365_v58, %v1350_v6  ;;  %v1392_v12 = vsel %vm1089_vm1, %v3321_v5, 0.0  ;;  %v2864_v6 = vld [vmem:[%s3549_s6 + $0x10] sm:$0xff]  }
 0x41a   : > { %2711 = vmatprep.subr.bf16.mxu1 %v2864_v6 }
 0x41b   : > { %v1386_v11 = vsel %vm1089_vm1, %v3326_v10, 0.0  ;;  %2712 = vmatpush3.bf16.msra.mxu1 %v2864_v6 }
 0x41c   : > { %1387 = vadd.xlane.f32.xlu0 %v1386_v11  ;;  %1393 = vadd.xlane.f32.xlu1 %v1392_v12  ;;  %v2866_v11 = vld [vmem:[%s3549_s6] sm:$0xff]  }
 0x41d   : > { %2713 = vmatprep.subr.bf16.mxu1 %v2865_v8  ;;  %v2578_v12 = vld [vmem:[%s3117_s30] ss:$0 sm:$0xff] }
 0x41f   : > { %2714 = vmatpush3.bf16.msra.mxu1 %v2865_v8 }
 0x420   : > { %1390 = vadd.xlane.f32.xlu0 %v1389_v7  ;;  %2715 = vmatprep.subr.bf16.mxu1 %v2866_v11 }
 0x423   : > { %2716 = vmatpush3.bf16.msra.mxu1 %v2866_v11 }
 0x4a1   : > { %v1385_v15 = vpop.xlane.xlu1 %1384 }
 0x4a2   : > { %v1395_v13 = vmul.f32 0.03125, %v1385_v15 }
 0x4a4   : > { %v1399_v14 = vsub.f32 %v3317_v0, %v1395_v13 }
 0x4a5   : > { %v1388_v16 = vpop.xlane.xlu0 %1387  ;;  %v1394_v17 = vpop.xlane.xlu1 %1393 }
 0x4a6   : > { %v1396_v18 = vmul.f32 0.03125, %v1388_v16  ;;  %v1398_v19 = vmul.f32 0.03125, %v1394_v17  ;;  %v1403_v20 = vmul.f32 %v1399_v14, %v1399_v14 }
 0x4a8   : > { %v1400_v21 = vsub.f32 %v3326_v10, %v1396_v18  ;;  %v1402_v22 = vsub.f32 %v3321_v5, %v1398_v19  ;;  %v1407_v23 = vsel %vm1089_vm1, %v1403_v20, 0.0 }
 0x4a9   : > { %v1391_v24 = vpop.xlane.xlu0 %1390  ;;  %1408 = vadd.xlane.f32.xlu0 %v1407_v23 }
 0x4aa   : > { %v1397_v25 = vmul.f32 0.03125, %v1391_v24  ;;  %v1404_v26 = vmul.f32 %v1400_v21, %v1400_v21  ;;  %v1406_v29 = vmul.f32 %v1402_v22, %v1402_v22 }
 0x4ac   : > { %v1401_v27 = vsub.f32 %v3328_v9, %v1397_v25  ;;  %v1410_v28 = vsel %vm1089_vm1, %v1404_v26, 0.0  ;;  %v1416_v32 = vsel %vm1089_vm1, %v1406_v29, 0.0 }
 0x4ad   : > { %1411 = vadd.xlane.f32.xlu1 %v1410_v28 }
 0x4ae   : > { %v1405_v30 = vmul.f32 %v1401_v27, %v1401_v27 }
 0x4b0   : > { %v1413_v31 = vsel %vm1089_vm1, %v1405_v30, 0.0 }
 0x4b1   : > { %1414 = vadd.xlane.f32.xlu0 %v1413_v31  ;;  %1417 = vadd.xlane.f32.xlu1 %v1416_v32 }
 0x532   : > { %v1409_v35 = vpop.xlane.xlu0 %1408 }
 0x533   : > { %v1419_v36 = vmul.f32 0.03125, %v1409_v35 }
 0x535   : > { %v1423_v37 = vadd.f32 1e-05, %v1419_v36 }
 0x536   : > { %v1412_v38 = vpop.xlane.xlu1 %1411 }
 0x537   : > { %2895 = vrsqrt.f32 %v1423_v37  ;;  %v1420_v39 = vmul.f32 0.03125, %v1412_v38 }
 0x539   : > { %v1424_v40 = vadd.f32 1e-05, %v1420_v39 }
 0x53a   : > { %v1415_v41 = vpop.xlane.xlu0 %1414  ;;  %v1418_v42 = vpop.xlane.xlu1 %1417 }
 0x53b   : > { %2897 = vrsqrt.f32 %v1424_v40  ;;  %v1421_v43 = vmul.f32 0.03125, %v1415_v41  ;;  %v1422_v44 = vmul.f32 0.03125, %v1418_v42 }
 0x53d   : > { %v1425_v45 = vadd.f32 1e-05, %v1421_v43  ;;  %v1426_v46 = vadd.f32 1e-05, %v1422_v44  ;;  %v2589_v43 = vld [vmem:[%s3554_s16] ss:$0 sm:$0xff] }
 0x53e   : > { %s3558_s16 = sld [smem:[#allocation11_spill]] }
 0x53f   : > { %2899 = vrsqrt.f32 %v1425_v45 }
 0x540   : > { %2901 = vrsqrt.f32 %v1426_v46 }
 0x544   : > { %v2896_v47 = vpop.eup %2895 }
 0x545   : > { %v1431_v48 = vmul.f32 %v2896_v47, %v1399_v14 }
 0x547   : > { %v1441_v52 = vmul.f32 %v2576_v49, %v1431_v48 }
 0x548   : > { %v2898_v50 = vpop.eup %2897 }
 0x549   : > { %v1432_v51 = vmul.f32 %v2898_v50, %v1400_v21  ;;  %v1451_v58 = vadd.f32 %v2577_v53, %v1441_v52 }
 0x54b   : > { %v1442_v54 = vmul.f32 %v2576_v49, %v1432_v51 }
 0x54c   : > { %v2900_v55 = vpop.eup %2899 }
 0x54d   : > { %v2902_v56 = vpop.eup %2901  ;;  %v1433_v57 = vmul.f32 %v2900_v55, %v1401_v27  ;;  %v1452_v59 = vadd.f32 %v2577_v53, %v1442_v54 }
 0x54e   : > { %v1434_v60 = vmul.f32 %v2902_v56, %v1402_v22 }
 0x54f   : > { %v1459_v61 = vpack.c.bf16 %v1452_v59, %v1451_v58  ;;  %v1443_v62 = vmul.f32 %v2576_v49, %v1433_v57 }
 0x550   : > { %v1444_v63 = vmul.f32 %v2576_v49, %v1434_v60 }
 0x551   : > { %2705 = vmatprep.mubr.msk.bf16.mxu0 %vm1089_vm1, %v1459_v61  ;;  %v1453_v1 = vadd.f32 %v2577_v53, %v1443_v62 }
 0x552   : > { %v1454_v2 = vadd.f32 %v2577_v53, %v1444_v63 }
 0x554   : > { %v1460_v3 = vpack.c.bf16 %v1454_v2, %v1453_v1 }
 0x556   : > { %2706 = vmatmul.mubr.msk.bf16.vlgmr.msra.gmra.mxu0 %vm1089_vm1, %v1460_v3 }
 0x616   : > { %v2707_v7 = vpop.f32.mrf.mxu0 }
 0x617   : > { %v1529_v15 = vadd.f32 %v2707_v7, %v2578_v12 }
 0x618   : > { %v1520_v13 = vpop.f32.mrf.mxu0 }
 0x619   : > { %v1521_v14 = vadd.f32 %v2578_v12, %v1520_v13  ;;  %v1541_v16 = vmul.f32 0.70710677, %v1529_v15  ;;  %v1537_v35 = vmul.f32 0.5, %v1529_v15 }
 0x61a   : > { %v2708_v17 = vpop.f32.mrf.mxu0 }
 0x61b   : > { %v1539_v18 = vmul.f32 0.70710677, %v1521_v14  ;;  %v1532_v19 = vadd.f32 %v2708_v17, %v2578_v12  ;;  %v1535_v32 = vmul.f32 0.5, %v1521_v14  ;;  %v1743_v14 = vld [vmem:[%s3555_s26 + $0x18] sm:$0xff]  ;;  %v1740_v17 = vld [vmem:[%s3555_s26] sm:$0xff] }
 0x61c   : > { %v1523_v20 = vpop.f32.mrf.mxu0 }
 0x61d   : > { %2903 = verf.f32 %v1539_v18  ;;  %v1542_v21 = vmul.f32 0.70710677, %v1532_v19  ;;  %v1524_v22 = vadd.f32 %v2578_v12, %v1523_v20  ;;  %v1538_v31 = vmul.f32 0.5, %v1532_v19  ;;  %v1741_v18 = vld [vmem:[%s3555_s26 + $0x8] sm:$0xff]  ;;  %v1924_v19 = vld [vmem:[%s3556_s10] sm:$0xff] }
 0x61e   : > { %2905 = verf.f32 %v1541_v16  ;;  %v1742_v16 = vld [vmem:[%s3555_s26 + $0x10] sm:$0xff]  ;;  %v1925_v20 = vld [vmem:[%s3556_s10 + $0x8] sm:$0xff] }
 0x61f   : > { %2907 = verf.f32 %v1542_v21  ;;  %v1540_v23 = vmul.f32 0.70710677, %v1524_v22  ;;  %v1536_v33 = vmul.f32 0.5, %v1524_v22  ;;  %v1926_v21 = vld [vmem:[%s3556_s10 + $0x10] sm:$0xff]  ;;  %v1927_v22 = vld [vmem:[%s3556_s10 + $0x18] sm:$0xff] }
 0x621   : > { %2909 = verf.f32 %v1540_v23  ;;  %v2867_v23 = vld [vmem:[%s3557_s15] sm:$0xff]  }
 0x622   : > { %2725 = vmatprep.mubr.msk.bf16.mxu0 %vm1089_vm1, %v2867_v23 }
 0x62a   : > { %v2904_v24 = vpop.eup %2903 }
 0x62b   : > { %v2906_v25 = vpop.eup %2905  ;;  %v1547_v27 = vadd.f32 1.0, %v2904_v24 }
 0x62c   : > { %v2908_v26 = vpop.eup %2907  ;;  %v1549_v30 = vadd.f32 1.0, %v2906_v25 }
 0x62d   : > { %v1550_v28 = vadd.f32 1.0, %v2908_v26  ;;  %v1551_v37 = vmul.f32 %v1547_v27, %v1535_v32 }
 0x62e   : > { %v2910_v29 = vpop.eup %2909  ;;  %v1553_v39 = vmul.f32 %v1549_v30, %v1537_v35 }
 0x62f   : > { %v1548_v34 = vadd.f32 1.0, %v2910_v29  ;;  %v1554_v36 = vmul.f32 %v1550_v28, %v1538_v31 }
 0x631   : > { %v1552_v38 = vmul.f32 %v1548_v34, %v1536_v33  ;;  %v1564_v41 = vpack.c.bf16 %v1554_v36, %v1553_v39 }
 0x633   : > { %v1563_v40 = vpack.c.bf16 %v1552_v38, %v1551_v37  ;;  %v2590_v38 = vld [vmem:[%s3558_s16] ss:$0 sm:$0xff]  ;;  %s3562_s16 = sld [smem:[#allocation17_spill]] }
 0x635   : > { %2717 = vmatprep.mubr.msk.bf16.mxu1 %vm1589_vm2, %v1563_v40 }
 0x636   : > { %2718 = vmatmul.mubr.msk.bf16.vlgmr.msra.gmra.mxu1 %vm1589_vm2, %v1564_v41 }
 0x6f6   : > { %v2719_v42 = vpop.f32.mrf.mxu1 }
 0x6f7   : > { %v1647_v44 = vadd.f32 %v2719_v42, %v3328_v9 }
 0x6f8   : > { %v1630_v45 = vpop.f32.mrf.mxu1 }
 0x6f9   : > { %v3359_v46 = vadd.f32 %v2589_v43, %v1647_v44  ;;  %v1645_v47 = vadd.f32 %v1630_v45, %v3317_v0  ;;  %v2591_v44 = vld [vmem:[%s3559_s3] ss:$0 sm:$0xff]  ;;  %s3561_s3 = sld [smem:[#allocation19_spill]] }
 0x6fa   : > { %v2720_v48 = vpop.f32.mrf.mxu1 }
 0x6fb   : > { %v3362_v49 = vadd.f32 %v2589_v43, %v1645_v47  ;;  %v1648_v50 = vadd.f32 %v2720_v48, %v3321_v5  ;;  %v1668_v51 = vsel %vm1089_vm1, %v3359_v46, 0.0 }
 0x6fc   : > { %1669 = vadd.xlane.f32.xlu0 %v1668_v51  ;;  %v1633_v52 = vpop.f32.mrf.mxu1 }
 0x6fd   : > { %v3367_v53 = vadd.f32 %v2589_v43, %v1648_v50  ;;  %v1646_v54 = vadd.f32 %v1633_v52, %v3326_v10  ;;  %v1662_v55 = vsel %vm1089_vm1, %v3362_v49, 0.0 }
 0x6ff   : > { %v3370_v9 = vadd.f32 %v2589_v43, %v1646_v54  ;;  %v1671_v0 = vsel %vm1089_vm1, %v3367_v53, 0.0 }
 0x700   : > { %1663 = vadd.xlane.f32.xlu0 %v1662_v55  ;;  %1672 = vadd.xlane.f32.xlu1 %v1671_v0 }
 0x701   : > { %v1665_v5 = vsel %vm1089_vm1, %v3370_v9, 0.0 }
 0x704   : > { %1666 = vadd.xlane.f32.xlu1 %v1665_v5 }
 0x785   : > { %v1670_v56 = vpop.xlane.xlu0 %1669 }
 0x786   : > { %v1676_v57 = vmul.f32 0.03125, %v1670_v56 }
 0x788   : > { %v1680_v58 = vsub.f32 %v3359_v46, %v1676_v57  ;;  %v2868_v57 = vld [vmem:[%s3557_s15 + $0x8] sm:$0xff]  }
 0x789   : > { %v1664_v59 = vpop.xlane.xlu0 %1663  ;;  %v1673_v10 = vpop.xlane.xlu1 %1672 }
 0x78a   : > { %v1674_v60 = vmul.f32 0.03125, %v1664_v59  ;;  %v1677_v61 = vmul.f32 0.03125, %v1673_v10  ;;  %v1684_v62 = vmul.f32 %v1680_v58, %v1680_v58 }
 0x78c   : > { %v1678_v63 = vsub.f32 %v3362_v49, %v1674_v60  ;;  %v1681_v1 = vsub.f32 %v3367_v53, %v1677_v61  ;;  %v1692_v2 = vsel %vm1089_vm1, %v1684_v62, 0.0 }
 0x78d   : > { %1693 = vadd.xlane.f32.xlu0 %v1692_v2  ;;  %v1667_v3 = vpop.xlane.xlu1 %1666 }
 0x78e   : > { %v1675_v4 = vmul.f32 0.03125, %v1667_v3  ;;  %v1682_v6 = vmul.f32 %v1678_v63, %v1678_v63  ;;  %v1685_v8 = vmul.f32 %v1681_v1, %v1681_v1 }
 0x790   : > { %v1679_v11 = vsub.f32 %v3370_v9, %v1675_v4  ;;  %v1686_v12 = vsel %vm1089_vm1, %v1682_v6, 0.0  ;;  %v1695_v7 = vsel %vm1089_vm1, %v1685_v8, 0.0 }
 0x791   : > { %1687 = vadd.xlane.f32.xlu0 %v1686_v12  ;;  %1696 = vadd.xlane.f32.xlu1 %v1695_v7 }
 0x792   : > { %v1683_v15 = vmul.f32 %v1679_v11, %v1679_v11 }
 0x794   : > { %v1689_v13 = vsel %vm1089_vm1, %v1683_v15, 0.0 }
 0x795   : > { %1690 = vadd.xlane.f32.xlu1 %v1689_v13 }
 0x7a6   : > { %1761 = vperm.xlu1 %2851, %v1743_v14  }
 0x7a7   : > { %1756 = vperm.xlu0 %2850, %v1742_v16  }
 0x7aa   : > { %1746 = vperm.xlu1 %2851, %v1740_v17  }
 0x7ab   : > { %1751 = vperm.xlu0 %2850, %v1741_v18  }
 0x7ae   : > { %1930 = vperm.xlu1 %2851, %v1924_v19  }
 0x7af   : > { %1935 = vperm.xlu0 %2850, %v1925_v20  }
 0x7b2   : > { %1940 = vperm.xlu1 %2851, %v1926_v21  }
 0x7b3   : > { %1945 = vperm.xlu0 %2850, %v1927_v22  }
 0x816   : > { %v1694_v24 = vpop.xlane.xlu0 %1693 }
 0x817   : > { %v1700_v25 = vmul.f32 0.03125, %v1694_v24 }
 0x819   : > { %v1704_v26 = vadd.f32 1e-05, %v1700_v25 }
 0x81a   : > { %v1688_v27 = vpop.xlane.xlu0 %1687  ;;  %v1697_v28 = vpop.xlane.xlu1 %1696 }
 0x81b   : > { %2911 = vrsqrt.f32 %v1704_v26  ;;  %v1698_v29 = vmul.f32 0.03125, %v1688_v27  ;;  %v1701_v30 = vmul.f32 0.03125, %v1697_v28 }
 0x81d   : > { %v1702_v31 = vadd.f32 1e-05, %v1698_v29  ;;  %v1705_v32 = vadd.f32 1e-05, %v1701_v30 }
 0x81e   : > { %v1691_v33 = vpop.xlane.xlu1 %1690 }
 0x81f   : > { %2913 = vrsqrt.f32 %v1702_v31  ;;  %v1699_v34 = vmul.f32 0.03125, %v1691_v33 }
 0x820   : > { %2915 = vrsqrt.f32 %v1705_v32  ;;  %v2870_v32 = vld [vmem:[%s3560_s5 + $0x8] sm:$0xff]  }
 0x821   : > { %v1703_v35 = vadd.f32 1e-05, %v1699_v34 }
 0x822   : > { %v1762_v59 = vpop.permute.xlu1 %1761  ;;  %v1757_v10 = vpop.permute.xlu0 %1756 }
 0x823   : > { %2917 = vrsqrt.f32 %v1703_v35 }
 0x826   : > { %v1747_v62 = vpop.permute.xlu1 %1746  ;;  %v1752_v8 = vpop.permute.xlu0 %1751 }
 0x828   : > { %v2912_v36 = vpop.eup %2911 }
 0x829   : > { %v1712_v37 = vmul.f32 %v2912_v36, %v1680_v58  ;;  %v2869_v58 = vld [vmem:[%s3560_s5] sm:$0xff]   ;;  %s3563_s5 = sld [smem:[#allocation18_spill]] }
 0x82a   : > { %v1936_v33 = vpop.permute.xlu0 %1935 }
 0x82b   : > { %v1722_v43 = vmul.f32 %v2590_v38, %v1712_v37  ;;  %v1931_v37 = vpop.permute.xlu1 %1930 }
 0x82c   : > { %v2914_v39 = vpop.eup %2913 }
 0x82d   : > { %v2916_v40 = vpop.eup %2915  ;;  %v1710_v41 = vmul.f32 %v2914_v39, %v1678_v63  ;;  %v1732_v51 = vadd.f32 %v2591_v44, %v1722_v43 }
 0x82e   : > { %v1713_v42 = vmul.f32 %v2916_v40, %v1681_v1 }
 0x82f   : > { %v1720_v50 = vmul.f32 %v2590_v38, %v1710_v41  ;;  %v1946_v41 = vpop.permute.xlu0 %1945 }
 0x830   : > { %v2918_v45 = vpop.eup %2917  ;;  %v1723_v47 = vmul.f32 %v2590_v38, %v1713_v42 }
 0x831   : > { %v1711_v48 = vmul.f32 %v2918_v45, %v1679_v11  ;;  %v1730_v0 = vadd.f32 %v2591_v44, %v1720_v50 }
 0x832   : > { %v1733_v52 = vadd.f32 %v2591_v44, %v1723_v47 }
 0x833   : > { %v1721_v54 = vmul.f32 %v2590_v38, %v1711_v48 }
 0x834   : > { %v1739_v55 = vpack.c.bf16 %v1733_v52, %v1732_v51 }
 0x835   : > { %v1731_v5 = vadd.f32 %v2591_v44, %v1721_v54 }
 0x836   : > { %2721 = vmatprep.subr.bf16.mxu0 %v1739_v55 }
 0x837   : > { %2722 = vmatpush3.bf16.msra.mxu0 %v1739_v55  ;;  %v1738_v56 = vpack.c.bf16 %v1731_v5, %v1730_v0 }
 0x839   : > { %2723 = vmatprep.subr.bf16.mxu0 %v1738_v56 }
 0x83b   : > { %2724 = vmatpush3.bf16.msra.mxu0 %v1738_v56 }
 0x83e   : > { %2726 = vmatmul.mubr.msk.bf16.vlgmr.msra.gmra.mxu0 %vm1089_vm1, %v2868_v57 }
 0x83f   : > { %2733 = vmatprep.mubr.msk.bf16.mxu0 %vm1089_vm1, %v2869_v58 }
 0x8fe   : > { %v2727_v60 = vpop.f32.mrf.mxu0 }
 0x8ff   : > { %v1823_v61 = vadd.f32 %v2727_v60, %v1757_v10 }
 0x900   : > { %v1814_v63 = vpop.f32.mrf.mxu0 }
 0x901   : > { %v1835_v1 = vmul.f32 0.70710677, %v1823_v61  ;;  %v1815_v2 = vadd.f32 %v1814_v63, %v1747_v62  ;;  %v1831_v18 = vmul.f32 0.5, %v1823_v61 }
 0x902   : > { %v2728_v3 = vpop.f32.mrf.mxu0 }
 0x903   : > { %2919 = verf.f32 %v1835_v1  ;;  %v1833_v4 = vmul.f32 0.70710677, %v1815_v2  ;;  %v1826_v6 = vadd.f32 %v2728_v3, %v1762_v59  ;;  %v1829_v23 = vmul.f32 0.5, %v1815_v2 }
 0x904   : > { %v1817_v11 = vpop.f32.mrf.mxu0 }
 0x905   : > { %2921 = verf.f32 %v1833_v4  ;;  %v1836_v12 = vmul.f32 0.70710677, %v1826_v6  ;;  %v1818_v7 = vadd.f32 %v1817_v11, %v1752_v8  ;;  %v1832_v20 = vmul.f32 0.5, %v1826_v6  ;;  %v2871_v8 = vld [vmem:[%s3561_s3 + $0x8] sm:$0xff]   ;;  %v2872_v11 = vld [vmem:[%s3561_s3] sm:$0xff]   ;;  %s3564_s3 = sld [smem:[#allocation21_spill]] }
 0x906   : > { %2737 = vmatprep.subr.bf16.mxu1 %v2871_v8 }
 0x907   : > { %2923 = verf.f32 %v1836_v12  ;;  %v1834_v15 = vmul.f32 0.70710677, %v1818_v7  ;;  %v1830_v26 = vmul.f32 0.5, %v1818_v7  ;;  %2738 = vmatpush3.bf16.msra.mxu1 %v2871_v8 }
 0x908   : > { %2739 = vmatprep.subr.bf16.mxu1 %v2872_v11 }
 0x909   : > { %2925 = verf.f32 %v1834_v15 }
 0x90b   : > { %2740 = vmatpush3.bf16.msra.mxu1 %v2872_v11 }
 0x910   : > { %v2920_v13 = vpop.eup %2919 }
 0x911   : > { %v1843_v16 = vadd.f32 1.0, %v2920_v13 }
 0x912   : > { %v2922_v14 = vpop.eup %2921 }
 0x913   : > { %v1841_v19 = vadd.f32 1.0, %v2922_v14  ;;  %v1847_v24 = vmul.f32 %v1843_v16, %v1831_v18 }
 0x914   : > { %v2924_v17 = vpop.eup %2923 }
 0x915   : > { %v1844_v21 = vadd.f32 1.0, %v2924_v17  ;;  %v1845_v28 = vmul.f32 %v1841_v19, %v1829_v23 }
 0x916   : > { %v2926_v22 = vpop.eup %2925 }
 0x917   : > { %v1848_v25 = vmul.f32 %v1844_v21, %v1832_v20  ;;  %v1842_v27 = vadd.f32 1.0, %v2926_v22 }
 0x919   : > { %v1846_v29 = vmul.f32 %v1842_v27, %v1830_v26  ;;  %v1854_v30 = vpack.c.bf16 %v1848_v25, %v1847_v24  ;;  %v2600_v25 = vld [vmem:[%s3562_s16] ss:$0 sm:$0xff]  ;;  %s3565_s16 = sld [smem:[#allocation20_spill]] }
 0x91b   : > { %2729 = vmatprep.subr.bf16.mxu0 %v1854_v30  ;;  %v1853_v31 = vpack.c.bf16 %v1846_v29, %v1845_v28  ;;  %v2601_v29 = vld [vmem:[%s3563_s5] ss:$0 sm:$0xff]  ;;  %s3566_s5 = sld [smem:[#allocation22_spill]] }
 0x91c   : > { %2730 = vmatpush3.bf16.msra.mxu0 %v1854_v30 }
 0x91d   : > { %2731 = vmatprep.subr.bf16.mxu0 %v1853_v31 }
 0x920   : > { %2732 = vmatpush3.bf16.msra.mxu0 %v1853_v31 }
 0x923   : > { %2734 = vmatmul.mubr.msk.bf16.vlgmr.msra.gmra.mxu0 %vm1089_vm1, %v2870_v32 }
 0x9e3   : > { %v2735_v34 = vpop.f32.mrf.mxu0 }
 0x9e4   : > { %v1922_v43 = vadd.f32 %v2735_v34, %v3359_v46 }
 0x9e5   : > { %v1905_v35 = vpop.f32.mrf.mxu0 }
 0x9e6   : > { %v1920_v36 = vadd.f32 %v1905_v35, %v3362_v49  ;;  %v1941_v49 = vpop.permute.xlu1 %1940 }
 0x9e7   : > { %v2736_v38 = vpop.f32.mrf.mxu0  ;;  %v3416_v50 = vadd.f32 %v1941_v49, %v1922_v43  ;;  %v2875_v49 = vld [vmem:[%s3564_s3 + $0x8] sm:$0xff]  }
 0x9e8   : > { %v3405_v39 = vadd.f32 %v1931_v37, %v1920_v36  ;;  %v1923_v40 = vadd.f32 %v2736_v38, %v3367_v53 }
 0x9e9   : > { %v1908_v42 = vpop.f32.mrf.mxu0  ;;  %v1960_v46 = vsel %vm1089_vm1, %v3416_v50, 0.0 }
 0x9ea   : > { %v3409_v44 = vadd.f32 %v1946_v41, %v1923_v40  ;;  %v1921_v45 = vadd.f32 %v1908_v42, %v3370_v9  ;;  %v1954_v47 = vsel %vm1089_vm1, %v3405_v39, 0.0 }
 0x9eb   : > { %1955 = vadd.xlane.f32.xlu1 %v1954_v47  ;;  %v2874_v47 = vld [vmem:[%s3564_s3 + $0x10] sm:$0xff]  }
 0x9ec   : > { %v3414_v48 = vadd.f32 %v1936_v33, %v1921_v45  ;;  %v1963_v51 = vsel %vm1089_vm1, %v3409_v44, 0.0  ;;  %v2873_v45 = vld [vmem:[%s3564_s3 + $0x18] sm:$0xff]  }
 0x9ed   : > { %2745 = vmatprep.subr.bf16.mxu0 %v2873_v45 }
 0x9ee   : > { %v1957_v53 = vsel %vm1089_vm1, %v3414_v48, 0.0  ;;  %2746 = vmatpush3.bf16.msra.mxu0 %v2873_v45 }
 0x9ef   : > { %1958 = vadd.xlane.f32.xlu0 %v1957_v53  ;;  %1964 = vadd.xlane.f32.xlu1 %v1963_v51  ;;  %v2876_v53 = vld [vmem:[%s3564_s3] sm:$0xff]   ;;  %s2622_s3 = sshll.u32 %s3240_s0, 5  ;;  %s3048_s0 = smov [#allocation2]  }
 0x9f0   : > { %2747 = vmatprep.subr.bf16.mxu0 %v2874_v47  ;;  %v2602_v51 = vld [vmem:[%s3565_s16] ss:$0 sm:$0xff]  ;;  %s3567_s16 = sld [smem:[#allocation23_spill]]  ;;  %s3471_s9 = scalar_lea.hbm %s3217_s27, %s2622_s3 }
 0x9f2   : > { %2748 = vmatpush3.bf16.msra.mxu0 %v2874_v47 }
 0x9f3   : > { %1961 = vadd.xlane.f32.xlu0 %v1960_v46  ;;  %2749 = vmatprep.subr.bf16.mxu0 %v2875_v49 }
 0x9f6   : > { %2750 = vmatpush3.bf16.msra.mxu0 %v2875_v49 }
 0x9f7   : > { %2751 = vmatprep.subr.bf16.mxu0 %v2876_v53 }
 0x9fa   : > { %2752 = vmatpush3.bf16.msra.mxu0 %v2876_v53 }
 0xa74   : > { %v1956_v9 = vpop.xlane.xlu1 %1955 }
 0xa75   : > { %v1966_v52 = vmul.f32 0.03125, %v1956_v9 }
 0xa77   : > { %v1970_v54 = vsub.f32 %v3405_v39, %v1966_v52 }
 0xa78   : > { %v1959_v55 = vpop.xlane.xlu0 %1958  ;;  %v1965_v0 = vpop.xlane.xlu1 %1964 }
 0xa79   : > { %v1967_v5 = vmul.f32 0.03125, %v1959_v55  ;;  %v1969_v56 = vmul.f32 0.03125, %v1965_v0  ;;  %v1974_v57 = vmul.f32 %v1970_v54, %v1970_v54 }
 0xa7b   : > { %v1971_v58 = vsub.f32 %v3414_v48, %v1967_v5  ;;  %v1973_v59 = vsub.f32 %v3409_v44, %v1969_v56  ;;  %v1978_v10 = vsel %vm1089_vm1, %v1974_v57, 0.0 }
 0xa7c   : > { %v1962_v60 = vpop.xlane.xlu0 %1961  ;;  %1979 = vadd.xlane.f32.xlu0 %v1978_v10 }
 0xa7d   : > { %v1968_v61 = vmul.f32 0.03125, %v1962_v60  ;;  %v1975_v62 = vmul.f32 %v1971_v58, %v1971_v58  ;;  %v1977_v2 = vmul.f32 %v1973_v59, %v1973_v59 }
 0xa7f   : > { %v1972_v63 = vsub.f32 %v3416_v50, %v1968_v61  ;;  %v1981_v1 = vsel %vm1089_vm1, %v1975_v62, 0.0  ;;  %v1987_v6 = vsel %vm1089_vm1, %v1977_v2, 0.0 }
 0xa80   : > { %1982 = vadd.xlane.f32.xlu1 %v1981_v1 }
 0xa81   : > { %v1976_v3 = vmul.f32 %v1972_v63, %v1972_v63 }
 0xa83   : > { %v1984_v4 = vsel %vm1089_vm1, %v1976_v3, 0.0 }
 0xa84   : > { %1985 = vadd.xlane.f32.xlu0 %v1984_v4  ;;  %1988 = vadd.xlane.f32.xlu1 %v1987_v6 }
 0xb05   : > { %v1980_v12 = vpop.xlane.xlu0 %1979 }
 0xb06   : > { %v1990_v7 = vmul.f32 0.03125, %v1980_v12 }
 0xb08   : > { %v1994_v15 = vadd.f32 1e-05, %v1990_v7 }
 0xb09   : > { %v1983_v13 = vpop.xlane.xlu1 %1982 }
 0xb0a   : > { %2927 = vrsqrt.f32 %v1994_v15  ;;  %v1991_v14 = vmul.f32 0.03125, %v1983_v13 }
 0xb0c   : > { %v1995_v16 = vadd.f32 1e-05, %v1991_v14 }
 0xb0d   : > { %v1986_v17 = vpop.xlane.xlu0 %1985  ;;  %v1989_v18 = vpop.xlane.xlu1 %1988 }
 0xb0e   : > { %2929 = vrsqrt.f32 %v1995_v16  ;;  %v1992_v19 = vmul.f32 0.03125, %v1986_v17  ;;  %v1993_v20 = vmul.f32 0.03125, %v1989_v18 }
 0xb10   : > { %v1996_v21 = vadd.f32 1e-05, %v1992_v19  ;;  %v1997_v22 = vadd.f32 1e-05, %v1993_v20  ;;  %v2613_v19 = vld [vmem:[%s3566_s5] ss:$0 sm:$0xff] }
 0xb11   : > { %s3568_s5 = sld [smem:[#allocation24_spill]] }
 0xb12   : > { %2931 = vrsqrt.f32 %v1996_v21 }
 0xb13   : > { %2933 = vrsqrt.f32 %v1997_v22 }
 0xb17   : > { %v2928_v23 = vpop.eup %2927 }
 0xb18   : > { %v2002_v24 = vmul.f32 %v2928_v23, %v1970_v54 }
 0xb1a   : > { %v2012_v28 = vmul.f32 %v2600_v25, %v2002_v24 }
 0xb1b   : > { %v2930_v26 = vpop.eup %2929 }
 0xb1c   : > { %v2003_v27 = vmul.f32 %v2930_v26, %v1971_v58  ;;  %v2022_v34 = vadd.f32 %v2601_v29, %v2012_v28 }
 0xb1e   : > { %v2013_v30 = vmul.f32 %v2600_v25, %v2003_v27 }
 0xb1f   : > { %v2932_v31 = vpop.eup %2931 }
 0xb20   : > { %v2934_v32 = vpop.eup %2933  ;;  %v2004_v33 = vmul.f32 %v2932_v31, %v1972_v63  ;;  %v2023_v35 = vadd.f32 %v2601_v29, %v2013_v30 }
 0xb21   : > { %v2005_v36 = vmul.f32 %v2934_v32, %v1973_v59 }
 0xb22   : > { %v2030_v37 = vpack.c.bf16 %v2023_v35, %v2022_v34  ;;  %v2014_v38 = vmul.f32 %v2600_v25, %v2004_v33 }
 0xb23   : > { %v2015_v40 = vmul.f32 %v2600_v25, %v2005_v36 }
 0xb24   : > { %2741 = vmatprep.mubr.msk.bf16.mxu1 %vm1089_vm1, %v2030_v37  ;;  %v2024_v41 = vadd.f32 %v2601_v29, %v2014_v38 }
 0xb25   : > { %v2025_v42 = vadd.f32 %v2601_v29, %v2015_v40 }
 0xb27   : > { %v2031_v43 = vpack.c.bf16 %v2025_v42, %v2024_v41 }
 0xb29   : > { %2742 = vmatmul.mubr.msk.bf16.vlgmr.msra.gmra.mxu1 %vm1089_vm1, %v2031_v43 }
 0xbe9   : > { %v2743_v46 = vpop.f32.mrf.mxu1 }
 0xbea   : > { %v2100_v9 = vadd.f32 %v2743_v46, %v2602_v51 }
 0xbeb   : > { %v2091_v52 = vpop.f32.mrf.mxu1 }
 0xbec   : > { %v2092_v54 = vadd.f32 %v2602_v51, %v2091_v52  ;;  %v2112_v55 = vmul.f32 0.70710677, %v2100_v9  ;;  %v2108_v12 = vmul.f32 0.5, %v2100_v9 }
 0xbed   : > { %v2744_v0 = vpop.f32.mrf.mxu1 }
 0xbee   : > { %v2110_v5 = vmul.f32 0.70710677, %v2092_v54  ;;  %v2103_v56 = vadd.f32 %v2744_v0, %v2602_v51  ;;  %v2106_v6 = vmul.f32 0.5, %v2092_v54  ;;  %v3046_v54 = vmov 0.0  }
 0xbef   : > { %v2094_v57 = vpop.f32.mrf.mxu1  ;;  %2757 = vmatprep.subr.mxu1 %v3046_v54  ;;  %2765 = vmatprep.mubr.msk.f32.mxu1 %vm3047_vm3, %v3046_v54 }
 0xbf0   : > { %2935 = verf.f32 %v2110_v5  ;;  %v2113_v58 = vmul.f32 0.70710677, %v2103_v56  ;;  %v2095_v59 = vadd.f32 %v2602_v51, %v2094_v57  ;;  %v2109_v4 = vmul.f32 0.5, %v2103_v56 }
 0xbf1   : > { %2937 = verf.f32 %v2112_v55 }
 0xbf2   : > { %2939 = verf.f32 %v2113_v58  ;;  %v2111_v10 = vmul.f32 0.70710677, %v2095_v59  ;;  %v2107_v8 = vmul.f32 0.5, %v2095_v59 }
 0xbf4   : > { %2941 = verf.f32 %v2111_v10 }
 0xbfd   : > { %v2936_v60 = vpop.eup %2935 }
 0xbfe   : > { %v2938_v61 = vpop.eup %2937  ;;  %v2118_v63 = vadd.f32 1.0, %v2936_v60 }
 0xbff   : > { %v2940_v62 = vpop.eup %2939  ;;  %v2120_v3 = vadd.f32 1.0, %v2938_v61 }
 0xc00   : > { %v2121_v1 = vadd.f32 1.0, %v2940_v62  ;;  %v2122_v15 = vmul.f32 %v2118_v63, %v2106_v6  ;;  %v2614_v6 = vld [vmem:[%s3567_s16] ss:$0 sm:$0xff]  ;;  %s977_s16 = sand.u32 1, %s3003_s1  }
 0xc01   : > { %v2942_v2 = vpop.eup %2941  ;;  %v2124_v14 = vmul.f32 %v2120_v3, %v2108_v12 }
 0xc02   : > { %v2119_v11 = vadd.f32 1.0, %v2942_v2  ;;  %v2125_v7 = vmul.f32 %v2121_v1, %v2109_v4 }
 0xc04   : > { %v2123_v13 = vmul.f32 %v2119_v11, %v2107_v8  ;;  %v2135_v17 = vpack.c.bf16 %v2125_v7, %v2124_v14 }
 0xc06   : > { %v2134_v16 = vpack.c.bf16 %v2123_v13, %v2122_v15  ;;  %v2615_v13 = vld [vmem:[%s3568_s5] ss:$0 sm:$0xff]  ;;  %s2555_s5 = sshll.u32 %s977_s16, 1 }
 0xc07   : > { %s979_s6 = scalar_lea.vmem [#allocation2], %s2555_s5  ;;  %s2955_s5 = sshll.u32 %s3048_s0, 4  ;;  %s2956_s5 = int_to_ptr.vmem [resolvable:$false] %s2955_s5 }
 0xc08   : > { %2753 = vmatprep.mubr.msk.bf16.mxu0 %vm1589_vm2, %v2134_v16  ;;  %s2460_s8 = sshll.u32 %s979_s6, 4  ;;  %s3473_s8 = int_to_ptr.vmem [resolvable:$true] %s2460_s8 }
 0xc09   : > { %2754 = vmatmul.mubr.msk.bf16.vlgmr.msra.gmra.mxu0 %vm1589_vm2, %v2135_v17  ;;  %s2951_s10 = scalar_lea.vmem %s3473_s8, 32  ;;  %p2958_p0 = scmp.lt.s32.totalorder %s3473_s8, %s2956_s5 }
 0xc0a   : > { %p2952_p11 = scmp.ne.s32.totalorder %s3473_s8, %s2951_s10 }
 0xc0c   : > { %p2953_p12 = pnand %p2952_p11, %p3257_p5 }
 0xc0e   : > { %p2954_p13 = pneg %p2953_p12 }
 0xcc9   : > { %v2755_v18 = vpop.f32.mrf.mxu0 }
 0xcca   : > { %v2217_v20 = vadd.f32 %v2755_v18, %v3416_v50 }
 0xccb   : > { %v2200_v21 = vpop.f32.mrf.mxu0 }
 0xccc   : > { %v2215_v22 = vadd.f32 %v2200_v21, %v3405_v39  ;;  %v2228_v23 = vadd.f32 %v2613_v19, %v2217_v20 }
 0xccd   : > { %v2756_v24 = vpop.f32.mrf.mxu0 }
 0xcce   : > { %v2218_v25 = vadd.f32 %v2756_v24, %v3409_v44  ;;  %v2238_v26 = vsel %vm1089_vm1, %v2228_v23, 0.0  ;;  %v2226_v27 = vadd.f32 %v2613_v19, %v2215_v22  ;;  %v2304_v22 = vld [vmem:[%s3212_s20] sm:$0x3] }
 0xccf   : > { %2239 = vadd.xlane.f32.xlu1 %v2238_v26  ;;  %v2203_v28 = vpop.f32.mrf.mxu0  ;;  %v2878_v24 = vld [vmem:[%s3546_s4] sm:$0xff]  }
 0xcd0   : > { %v2216_v29 = vadd.f32 %v2203_v28, %v3414_v48  ;;  %v2229_v30 = vadd.f32 %v2613_v19, %v2218_v25  ;;  %v2232_v31 = vsel %vm1089_vm1, %v2226_v27, 0.0  ;;  %v2617_v28 = vld [vmem:[%s3569_s12] ss:$0 sm:$0xff]  ;;  %s2957_s12 = scalar_lea.vmem %s2956_s5, 64 }
 0xcd1   : > { %p2959_p1 = scmp.lt.s32.totalorder %s2957_s12, %s2951_s10 }
 0xcd2   : > { %v2241_v32 = vsel %vm1089_vm1, %v2229_v30, 0.0  ;;  %v2227_v50 = vadd.f32 %v2613_v19, %v2216_v29 }
 0xcd3   : > { %2233 = vadd.xlane.f32.xlu1 %v2232_v31  ;;  %2242 = vadd.xlane.f32.xlu0 %v2241_v32  ;;  %p2960_p2 = por %p2959_p1, %p2958_p0 }
 0xcd4   : > { %v2235_v39 = vsel %vm1089_vm1, %v2227_v50, 0.0 }
 0xcd5   : > { %p2961_p3 = pnand %p2960_p2, %p2954_p13 }
 0xcd7   : > { %2236 = vadd.xlane.f32.xlu0 %v2235_v39 }
 0xd58   : > { %v2240_v33 = vpop.xlane.xlu1 %2239 }
 0xd59   : > { %v2246_v44 = vmul.f32 0.03125, %v2240_v33 }
 0xd5b   : > { %v2250_v34 = vsub.f32 %v2228_v23, %v2246_v44  ;;  %v2877_v23 = vld [vmem:[%s3546_s4 + $0x8] sm:$0xff]   ;;  %s2447_s4 = scalar_lea.sflag [#allocation3], %s977_s16 }
 0xd5c   : > { %v2234_v35 = vpop.xlane.xlu1 %2233  ;;  %v2243_v36 = vpop.xlane.xlu0 %2242 }
 0xd5d   : > { %v2244_v37 = vmul.f32 0.03125, %v2234_v35  ;;  %v2247_v38 = vmul.f32 0.03125, %v2243_v36  ;;  %v2254_v40 = vmul.f32 %v2250_v34, %v2250_v34 }
 0xd5f   : > { %v2248_v48 = vsub.f32 %v2226_v27, %v2244_v37  ;;  %v2251_v41 = vsub.f32 %v2229_v30, %v2247_v38  ;;  %v2262_v42 = vsel %vm1089_vm1, %v2254_v40, 0.0 }
 0xd60   : > { %2263 = vadd.xlane.f32.xlu1 %v2262_v42  ;;  %v2237_v43 = vpop.xlane.xlu0 %2236 }
 0xd61   : > { %v2245_v45 = vmul.f32 0.03125, %v2237_v43  ;;  %v2252_v47 = vmul.f32 %v2248_v48, %v2248_v48  ;;  %v2255_v49 = vmul.f32 %v2251_v41, %v2251_v41 }
 0xd63   : > { %v2249_v53 = vsub.f32 %v2227_v50, %v2245_v45  ;;  %v2256_v51 = vsel %vm1089_vm1, %v2252_v47, 0.0  ;;  %v2265_v46 = vsel %vm1089_vm1, %v2255_v49, 0.0 }
 0xd64   : > { %2257 = vadd.xlane.f32.xlu1 %v2256_v51  ;;  %2266 = vadd.xlane.f32.xlu0 %v2265_v46 }
 0xd65   : > { %v2253_v9 = vmul.f32 %v2249_v53, %v2249_v53 }
 0xd67   : > { %v2259_v52 = vsel %vm1089_vm1, %v2253_v9, 0.0 }
 0xd68   : > { %2260 = vadd.xlane.f32.xlu0 %v2259_v52 }
 0xde9   : > { %v2264_v55 = vpop.xlane.xlu1 %2263 }
 0xdea   : > { %v2270_v0 = vmul.f32 0.03125, %v2264_v55 }
 0xdec   : > { %v2274_v5 = vadd.f32 1e-05, %v2270_v0 }
 0xded   : > { %v2258_v56 = vpop.xlane.xlu1 %2257  ;;  %v2267_v57 = vpop.xlane.xlu0 %2266 }
 0xdee   : > { %v2268_v58 = vmul.f32 0.03125, %v2258_v56  ;;  %v2271_v59 = vmul.f32 0.03125, %v2267_v57  ;;  %2943 = vrsqrt.f32 %v2274_v5 }
 0xdf0   : > { %v2272_v10 = vadd.f32 1e-05, %v2268_v58  ;;  %v2275_v60 = vadd.f32 1e-05, %v2271_v59 }
 0xdf1   : > { %v2261_v61 = vpop.xlane.xlu0 %2260 }
 0xdf2   : > { %2945 = vrsqrt.f32 %v2272_v10  ;;  %v2269_v62 = vmul.f32 0.03125, %v2261_v61 }
 0xdf3   : > { %2947 = vrsqrt.f32 %v2275_v60 }
 0xdf4   : > { %v2273_v63 = vadd.f32 1e-05, %v2269_v62 }
 0xdf6   : > { %2949 = vrsqrt.f32 %v2273_v63 }
 0xdfb   : > { %v2944_v1 = vpop.eup %2943 }
 0xdfc   : > { %v2282_v3 = vmul.f32 %v2944_v1, %v2250_v34 }
 0xdfe   : > { %v2292_v7 = vmul.f32 %v2614_v6, %v2282_v3 }
 0xdff   : > { %v2946_v2 = vpop.eup %2945 }
 0xe00   : > { %v2948_v4 = vpop.eup %2947  ;;  %v2280_v15 = vmul.f32 %v2946_v2, %v2248_v48  ;;  %v2302_v18 = vadd.f32 %v2615_v13, %v2292_v7 }
 0xe01   : > { %v2283_v8 = vmul.f32 %v2948_v4, %v2251_v41 }
 0xe02   : > { %v2290_v19 = vmul.f32 %v2614_v6, %v2280_v15 }
 0xe03   : > { %v2950_v11 = vpop.eup %2949  ;;  %v2293_v12 = vmul.f32 %v2614_v6, %v2283_v8 }
 0xe04   : > { %v2281_v14 = vmul.f32 %v2950_v11, %v2249_v53  ;;  %v2300_v21 = vadd.f32 %v2615_v13, %v2290_v19 }
 0xe05   : > { %v2303_v16 = vadd.f32 %v2615_v13, %v2293_v12 }
 0xe06   : > { %v2291_v17 = vmul.f32 %v2614_v6, %v2281_v14 }
 0xe07   : > { %2758 = vmatpush3.msra.mxu1 %v2303_v16 }
 0xe08   : > { %2759 = vmatprep.subr.mxu1 %v3046_v54  ;;  %v2301_v20 = vadd.f32 %v2615_v13, %v2291_v17 }
 0xe09   : > { %2760 = vmatpush3.msra.mxu1 %v2302_v18 }
 0xe0a   : > { %2761 = vmatprep.subr.mxu1 %v3046_v54 }
 0xe0b   : > { %2762 = vmatpush3.msra.mxu1 %v2301_v20 }
 0xe0c   : > { %2763 = vmatprep.subr.mxu1 %v3046_v54 }
 0xe0d   : > { %2764 = vmatpush3.msra.mxu1 %v2300_v21 }
 0xe0e   : > { %2766 = vmatmul.mubr.msk.f32.vlgmr.msra.gmra.mxu1 %vm1089_vm1, %v2304_v22  ;;  %2768 = vmatprep.subr.bf16.mxu1 %v3046_v54 }
 0xe0f   : > { %2769 = vmatpush3.bf16.msra.mxu1 %v2877_v23  ;;  %2772 = vmatprep.mubr.msk.bf16.mxu1 %vm3047_vm3, %v3046_v54 }
 0xe10   : > { %2770 = vmatprep.subr.bf16.mxu1 %v3046_v54 }
 0xe13   : > { %2771 = vmatpush3.bf16.msra.mxu1 %v2878_v24 }
 0xece   : > { %v2374_v25 = vpop.f32.mrf.mxu1 }
 0xecf   : > { %v2382_v26 = vpack.c.bf16 %v2374_v25, %v2374_v25 }
 0xed0   : > { %v2767_v27 = vpop.f32.mrf.mxu1 }
 0xed1   : > { %2773 = vmatmul.mubr.msk.bf16.vlgmr.msra.gmra.mxu1 %vm1089_vm1, %v2382_v26 }
 0xf91   : > { %v2439_v29 = vpop.f32.mrf.mxu1 }
 0xf92   : > { %v2440_v30 = vadd.f32 %v2617_v28, %v2439_v29 }
 0xf93   : > { %v2774_v31 = vpop.f32.mrf.mxu1 }
 0xf94   : > { %2445 = vst [vmem:[%s979_s6] sm:$0x3] %v2440_v30 }
 0xf95   : > { %v2442_v32 = vpop.f32.mrf.mxu1 }
 0xf96   : > { %2964 = shalt.err (!%p2961_p3)
}
 0xf97   : > { %s2965_s6 = scalar_lea.hbm %s3471_s9, 32  ;;  %s2969_s3 = scalar_lea.hbm %s3217_s27, 64 }
 0xf98   : > { %p2966_p4 = scmp.ne.s32.totalorder %s3471_s9, %s2965_s6  ;;  %p2970_p9 = scmp.lt.s32.totalorder %s3471_s9, %s3217_s27 }
 0xf99   : > { %p2971_p10 = scmp.lt.s32.totalorder %s2969_s3, %s2965_s6 }
 0xf9a   : > { %p2967_p7 = pnand %p2966_p4, %p3257_p5 }
 0xf9b   : > { %p2972_p11 = por %p2971_p10, %p2970_p9 }
 0xf9c   : > { %p2968_p8 = pneg %p2967_p7 }
 0xf9e   : > { %p2973_p12 = pnand %p2972_p11, %p2968_p8 }
 0xfa0   : > { %2976 = shalt.err (!%p2973_p12)
}
 0xfa1   : > { %2776 = dma.vmem_to_hbm [thread:$0]  (%p3257_p5), %s3473_s8, 32, %s3471_s9, %s2447_s4   ;;  %v2775_v50 = vpop.f32.mrf.mxu1 }
 0xfa2 PF: > { %p2782_p13 = scmp.ge.s32.totalorder %s3011_s7, 2  ;;  %s2472_s12 = sand.u32 1, %s2999_s28  }
 0xfa3   : > { %s2473_s10 = scalar_lea.sflag [#allocation3], %s2472_s12 }
 0xfa4   : > { %p2779_p0 = pnand %p2782_p13, %p3261_p6 }
 0xfa6   : > { %p2780_p1 = pneg %p2779_p0 }
 0xfa8   : > { %2994 = dma.done.wait (%p2780_p1), %s2473_s10, 32  }
 0xfa9   : > { %2996 = vsyncadd (%p2780_p1), %s2473_s10, 4294967264  ;;  %p75_p2 = scmp.ge.s32.totalorder %s3244_s11, 4   ;;  %s3570_s28 = smov %s3003_s1 }
 0xfaa   : > { %s3571_s1 = smov %s3007_s2  ;;  %s3572_s2 = smov %s3255_s18 }
 0xfab   : > { %s3573_s7 = smov %s3244_s11  ;;  %77 = sbr.rel (!%p75_p2) target bundleno = 69 (0x45), region = 215 }
 0xfb0   :  { %2478 = vsyncpa [#allocation3], 1 }
 0xfb1   :  { %2480 = vsyncpa [#allocation3 + $0x1], 1 }

</bundles_post_ra>
